<compile_context>
chip_gen: v6e
topology: v6e:2x2x1
jax: 0.10.0
libtpu: 0.0.40
codegen_flags: <defaults>
</compile_context>

<pallas_src>
import jax
import jax.numpy as jnp
from jax.experimental import pallas as pl
from jax.experimental.pallas import tpu as pltpu

EPS = 1e-5
NEG_SLOPE = 0.2


def _vmem_limit_bytes():
    try:
        cap = pltpu.get_tpu_info().vmem_capacity_bytes
        return int(min(cap * 3 // 4, 96 * 1024 * 1024))
    except Exception:  # conservative fallback (fits v7x's 64 MiB physical)
        return 48 * 1024 * 1024


def _pick_rows(total_rows, per_row_bytes, budget_bytes, cap, other_grid):
    """Largest divisor of total_rows within cap / VMEM budget, shrunk if
    needed so the fully-parallel grid has >= 2 steps (v7x megacore)."""
    divisors = [d for d in range(1, total_rows + 1) if total_rows % d == 0]
    best = 1
    for d in divisors:
        if d <= cap and d * per_row_bytes <= budget_bytes:
            best = d
    while best > 1 and other_grid * (total_rows // best) < 2:
        best = [d for d in divisors if d < best][-1]
    return best


# --------------------- pass 1: in-kernel im2col conv + channel stats --------
def _make_conv_stats_kernel(th, w_out):
    def kernel(slab_ref, halo_ref, w_ref, conv_ref, stats_ref):
        # slab_ref : (1, th, Ws, 4*C_in) bf16  -- s2d rows [hb*th, hb*th+th)
        # halo_ref : (1, 1,  Ws, 4*C_in) bf16  -- s2d row hb*th+th (halo)
        # w_ref    : (4, 4*C_in, C_out)  bf16  -- resident (constant index_map)
        w00 = w_ref[0, :, :]
        w01 = w_ref[1, :, :]
        w10 = w_ref[2, :, :]
        w11 = w_ref[3, :, :]
        c_out = w00.shape[1]
        ssum = jnp.zeros((1, c_out), jnp.float32)
        ssq = jnp.zeros((1, c_out), jnp.float32)

        row_cur = slab_ref[0, 0, :, :]
        for t in range(th):
            if t + 1 < th:
                row_nxt = slab_ref[0, t + 1, :, :]
            else:
                row_nxt = halo_ref[0, 0, :, :]
            # 4 shifted matmuls == the 4x4 / stride-2 conv after space-to-depth.
            acc = jnp.dot(row_cur[0:w_out, :], w00,
                          preferred_element_type=jnp.float32)
            acc = acc + jnp.dot(row_cur[1:w_out + 1, :], w01,
                                preferred_element_type=jnp.float32)
            acc = acc + jnp.dot(row_nxt[0:w_out, :], w10,
                                preferred_element_type=jnp.float32)
            acc = acc + jnp.dot(row_nxt[1:w_out + 1, :], w11,
                                preferred_element_type=jnp.float32)
            conv_ref[0, t, :, :] = acc
            ssum = ssum + jnp.sum(acc, axis=0, keepdims=True)
            ssq = ssq + jnp.sum(acc * acc, axis=0, keepdims=True)
            row_cur = row_nxt

        stats_ref[0, 0, 0:1, :] = ssum
        stats_ref[0, 0, 1:2, :] = ssq

    return kernel


# --------------------- pass 2: folded BN affine + LeakyReLU -----------------
def _bn_lrelu_kernel(conv_ref, scale_ref, shift_ref, o_ref):
    y = conv_ref[...] * scale_ref[...] + shift_ref[...]
    o_ref[...] = jnp.where(y >= 0, y, NEG_SLOPE * y)


def downsampler_forward(x_nchw, weight, bias, gamma, beta,
                        kernel_size=4, stride=2, padding=1):
    """x: (N, C_in, H, W); weight: (C_out, C_in, kh, kw) (PyTorch layouts)."""
    del bias  # exactly cancelled by training-mode BatchNorm mean subtraction
    n, c_in, h, w = x_nchw.shape
    c_out, c_in_w, kh, kw = weight.shape
    assert c_in_w == c_in and kh == kernel_size and kw == kernel_size
    assert kernel_size == 2 * stride
    assert (h + 2 * padding) % stride == 0 and (w + 2 * padding) % stride == 0

    s = stride
    hs, ws = (h + 2 * padding) // s, (w + 2 * padding) // s   # s2d spatial
    h_out, w_out = hs - 1, ws - 1
    c4 = s * s * c_in
    m_total = n * h_out * w_out
    vmem_limit = _vmem_limit_bytes()

    # ---- wrapper layout (1x bytes): NCHW->NHWC, pad, space-to-depth --------
    x = jnp.transpose(x_nchw, (0, 2, 3, 1)).astype(jnp.float32)
    x = jnp.pad(x, ((0, 0), (padding, padding), (padding, padding), (0, 0)))
    x = x.reshape(n, hs, s, ws, s, c_in)
    s2d = jnp.transpose(x, (0, 1, 3, 2, 4, 5)).reshape(n, hs, ws, c4)
    s2d = s2d.astype(jnp.bfloat16)

    # Weight -> 4 shifted (4*C_in, C_out) blocks matching s2d channel order.
    wk = jnp.transpose(weight, (2, 3, 1, 0)).astype(jnp.float32)  # (kh,kw,ci,co)
    wk = wk.reshape(2, s, 2, s, c_in, c_out)
    wk = jnp.transpose(wk, (0, 2, 1, 3, 4, 5)).reshape(4, c4, c_out)
    wk = wk.astype(jnp.bfloat16)

    # ---- pass 1: conv (MXU, f32 accumulate) + per-block channel stats ------
    th1 = _pick_rows(h_out,
                     per_row_bytes=2 * (ws * c4 * 2 + w_out * c_out * 4),
                     budget_bytes=8 << 20, cap=32, other_grid=n)
    num_hb1 = h_out // th1

    conv_out, stats = pl.pallas_call(
        _make_conv_stats_kernel(th1, w_out),
        out_shape=(jax.ShapeDtypeStruct((n, h_out, w_out, c_out), jnp.float32),
                   jax.ShapeDtypeStruct((n, num_hb1, 2, c_out), jnp.float32)),
        grid=(n, num_hb1),
        in_specs=[
            pl.BlockSpec((1, th1, ws, c4), lambda i, j: (i, j, 0, 0)),
            pl.BlockSpec((1, 1, ws, c4), lambda i, j: (i, j * th1 + th1, 0, 0)),
            pl.BlockSpec((4, c4, c_out), lambda i, j: (0, 0, 0)),
        ],
        out_specs=(
            pl.BlockSpec((1, th1, w_out, c_out), lambda i, j: (i, j, 0, 0)),
            pl.BlockSpec((1, 1, 2, c_out), lambda i, j: (i, j, 0, 0)),
        ),
        compiler_params=pltpu.CompilerParams(
            dimension_semantics=("parallel", "parallel"),
            vmem_limit_bytes=vmem_limit),
        cost_estimate=pl.CostEstimate(
            flops=2 * m_total * (kernel_size * kernel_size * c_in) * c_out,
            transcendentals=0,
            bytes_accessed=(s2d.size * 2 + wk.size * 2
                            + m_total * c_out * 4
                            + n * num_hb1 * 2 * c_out * 4)),
    )(s2d, s2d, wk)

    # ---- tiny per-channel glue: batch stats -> folded BN scale/shift -------
    # NOTE: single-pass var = E[y^2] - E[y]^2 in f32, clamped at 0; fine at
    # these sizes (use a Welford-style combine if M reaches ~1e6+).
    totals = jnp.sum(stats, axis=(0, 1))                  # (2, C_out)
    mean = totals[0] / m_total
    var = jnp.maximum(totals[1] / m_total - mean * mean, 0.0)
    scale = gamma.astype(jnp.float32) * jax.lax.rsqrt(var + EPS)
    shift = beta.astype(jnp.float32) - mean * scale
    scale = scale.reshape(1, c_out)
    shift = shift.reshape(1, c_out)

    # ---- pass 2: y*scale + shift -> LeakyReLU, aliased onto conv_out -------
    th2 = _pick_rows(h_out, per_row_bytes=2 * (2 * w_out * c_out * 4),
                     budget_bytes=16 << 20, cap=h_out, other_grid=n)
    num_hb2 = h_out // th2

    out_nhwc = pl.pallas_call(
        _bn_lrelu_kernel,
        out_shape=jax.ShapeDtypeStruct((n, h_out, w_out, c_out), jnp.float32),
        grid=(n, num_hb2),
        in_specs=[
            pl.BlockSpec((1, th2, w_out, c_out), lambda i, j: (i, j, 0, 0)),
            pl.BlockSpec((1, c_out), lambda i, j: (0, 0)),
            pl.BlockSpec((1, c_out), lambda i, j: (0, 0)),
        ],
        out_specs=pl.BlockSpec((1, th2, w_out, c_out), lambda i, j: (i, j, 0, 0)),
        input_output_aliases={0: 0},
        compiler_params=pltpu.CompilerParams(
            dimension_semantics=("parallel", "parallel"),
            vmem_limit_bytes=vmem_limit),
        cost_estimate=pl.CostEstimate(
            flops=3 * m_total * c_out, transcendentals=0,
            bytes_accessed=2 * m_total * c_out * 4 + 4 * c_out * 4),
    )(conv_out, scale, shift)

    return jnp.transpose(out_nhwc, (0, 3, 1, 2))          # back to NCHW


def _reference(x_nchw, weight, bias, gamma, beta, stride=2, padding=1):
    """Pure-JAX reference (conv fed bf16 inputs to match the kernel's MXU feed)."""
    y = jax.lax.conv_general_dilated(
        x_nchw.astype(jnp.bfloat16), weight.astype(jnp.bfloat16),
        window_strides=(stride, stride),
        padding=((padding, padding), (padding, padding)),
        dimension_numbers=("NCHW", "OIHW", "NCHW"),
        preferred_element_type=jnp.float32)
    y = y + bias.reshape(1, -1, 1, 1)
    mean = jnp.mean(y, axis=(0, 2, 3), keepdims=True)
    var = jnp.mean((y - mean) ** 2, axis=(0, 2, 3), keepdims=True)
    y = (y - mean) * jax.lax.rsqrt(var + EPS)
    y = y * gamma.reshape(1, -1, 1, 1) + beta.reshape(1, -1, 1, 1)
    return jnp.where(y >= 0, y, NEG_SLOPE * y)


if __name__ == "__main__":
    # Small deterministic configuration: n_in=4, n_out=8, 16x16 spatial, batch 2.
    N, C_IN, H, W = 2, 4, 16, 16
    C_OUT, KH, KW = 8, 4, 4

    key = jax.random.PRNGKey(0)
    kx, kw_, kb, kg, kbe = jax.random.split(key, 5)
    x = jax.random.normal(kx, (N, C_IN, H, W), dtype=jnp.float32)
    weight = 0.1 * jax.random.normal(kw_, (C_OUT, C_IN, KH, KW), dtype=jnp.float32)
    bias = 0.1 * jax.random.normal(kb, (C_OUT,), dtype=jnp.float32)
    gamma = 1.0 + 0.1 * jax.random.normal(kg, (C_OUT,), dtype=jnp.float32)
    beta = 0.1 * jax.random.normal(kbe, (C_OUT,), dtype=jnp.float32)

    fwd = jax.jit(downsampler_forward)
    out = jax.block_until_ready(fwd(x, weight, bias, gamma, beta))

    ref = jax.block_until_ready(_reference(x, weight, bias, gamma, beta))
    assert out.shape == (N, C_OUT, H // 2, W // 2), out.shape
    err = float(jnp.max(jnp.abs(out - ref)))
    assert jnp.allclose(out, ref, rtol=2e-3, atol=2e-3), err
    print("KERNEL_OK")
</pallas_src>

<mosaic_0001>
module attributes {stable_mosaic.version = 11 : i64} {
  func.func @kernel(%arg0: i32, %arg1: i32, %arg2: memref<1x8x9x16xbf16, #tpu.memory_space<vmem>>, %arg3: memref<1x1x9x16xbf16, #tpu.memory_space<vmem>>, %arg4: memref<4x16x8xbf16, #tpu.memory_space<vmem>>, %arg5: memref<1x8x8x8xf32, #tpu.memory_space<vmem>>, %arg6: memref<1x1x2x8xf32, #tpu.memory_space<vmem>>) attributes {dimension_semantics = [#tpu.dimension_semantics<parallel>, #tpu.dimension_semantics<parallel>], iteration_bounds = array<i64: 2, 1>, scalar_prefetch = 0 : i64, scratch_operands = 0 : i64, tpu.core_type = #tpu.core_type<tc>, window_params = [{transform_indices = @transform_0, window_bounds = array<i64: 1, 8, 9, 16>}, {transform_indices = @transform_1, window_bounds = array<i64: 1, 1, 9, 16>}, {pipeline_mode = #tpu.pipeline_mode<synchronous>, transform_indices = @transform_2, window_bounds = array<i64: 4, 16, 8>}, {transform_indices = @transform_3, window_bounds = array<i64: 1, 8, 8, 8>}, {transform_indices = @transform_4, window_bounds = array<i64: 1, 1, 2, 8>}]} {
    %c0 = arith.constant 0 : index
    %c0_0 = arith.constant 0 : index
    %c0_1 = arith.constant 0 : index
    %0 = vector.load %arg4[%c0, %c0_0, %c0_1] : memref<4x16x8xbf16, #tpu.memory_space<vmem>>, vector<1x16x8xbf16>
    %1 = vector.shape_cast %0 : vector<1x16x8xbf16> to vector<16x8xbf16>
    %c1 = arith.constant 1 : index
    %c0_2 = arith.constant 0 : index
    %c0_3 = arith.constant 0 : index
    %2 = vector.load %arg4[%c1, %c0_2, %c0_3] : memref<4x16x8xbf16, #tpu.memory_space<vmem>>, vector<1x16x8xbf16>
    %3 = vector.shape_cast %2 : vector<1x16x8xbf16> to vector<16x8xbf16>
    %c2 = arith.constant 2 : index
    %c0_4 = arith.constant 0 : index
    %c0_5 = arith.constant 0 : index
    %4 = vector.load %arg4[%c2, %c0_4, %c0_5] : memref<4x16x8xbf16, #tpu.memory_space<vmem>>, vector<1x16x8xbf16>
    %5 = vector.shape_cast %4 : vector<1x16x8xbf16> to vector<16x8xbf16>
    %c3 = arith.constant 3 : index
    %c0_6 = arith.constant 0 : index
    %c0_7 = arith.constant 0 : index
    %6 = vector.load %arg4[%c3, %c0_6, %c0_7] : memref<4x16x8xbf16, #tpu.memory_space<vmem>>, vector<1x16x8xbf16>
    %7 = vector.shape_cast %6 : vector<1x16x8xbf16> to vector<16x8xbf16>
    %cst = arith.constant 0.000000e+00 : f32
    %8 = vector.broadcast %cst : f32 to vector<1x8xf32>
    %cst_8 = arith.constant 0.000000e+00 : f32
    %9 = vector.broadcast %cst_8 : f32 to vector<1x8xf32>
    %c0_9 = arith.constant 0 : index
    %c0_10 = arith.constant 0 : index
    %c0_11 = arith.constant 0 : index
    %c0_12 = arith.constant 0 : index
    %10 = vector.load %arg2[%c0_9, %c0_10, %c0_11, %c0_12] : memref<1x8x9x16xbf16, #tpu.memory_space<vmem>>, vector<1x1x9x16xbf16>
    %11 = vector.shape_cast %10 : vector<1x1x9x16xbf16> to vector<9x16xbf16>
    %c0_13 = arith.constant 0 : index
    %c1_14 = arith.constant 1 : index
    %c0_15 = arith.constant 0 : index
    %c0_16 = arith.constant 0 : index
    %12 = vector.load %arg2[%c0_13, %c1_14, %c0_15, %c0_16] : memref<1x8x9x16xbf16, #tpu.memory_space<vmem>>, vector<1x1x9x16xbf16>
    %13 = vector.shape_cast %12 : vector<1x1x9x16xbf16> to vector<9x16xbf16>
    %14 = vector.extract_strided_slice %11 {offsets = [0, 0], sizes = [8, 16], strides = [1, 1]} : vector<9x16xbf16> to vector<8x16xbf16>
    %cst_17 = arith.constant dense<0.000000e+00> : vector<8x8xf32>
    %15 = tpu.matmul %14, %1, %cst_17 {dimension_numbers = #tpu.dot_dimension_numbers<[1], [0], [0], [1], [0, 0, 1, 1], [], []>} : vector<8x16xbf16>, vector<16x8xbf16>, vector<8x8xf32> -> vector<8x8xf32>
    %16 = vector.extract_strided_slice %11 {offsets = [1, 0], sizes = [8, 16], strides = [1, 1]} : vector<9x16xbf16> to vector<8x16xbf16>
    %cst_18 = arith.constant dense<0.000000e+00> : vector<8x8xf32>
    %17 = tpu.matmul %16, %3, %cst_18 {dimension_numbers = #tpu.dot_dimension_numbers<[1], [0], [0], [1], [0, 0, 1, 1], [], []>} : vector<8x16xbf16>, vector<16x8xbf16>, vector<8x8xf32> -> vector<8x8xf32>
    %18 = arith.addf %15, %17 : vector<8x8xf32>
    %19 = vector.extract_strided_slice %13 {offsets = [0, 0], sizes = [8, 16], strides = [1, 1]} : vector<9x16xbf16> to vector<8x16xbf16>
    %cst_19 = arith.constant dense<0.000000e+00> : vector<8x8xf32>
    %20 = tpu.matmul %19, %5, %cst_19 {dimension_numbers = #tpu.dot_dimension_numbers<[1], [0], [0], [1], [0, 0, 1, 1], [], []>} : vector<8x16xbf16>, vector<16x8xbf16>, vector<8x8xf32> -> vector<8x8xf32>
    %21 = arith.addf %18, %20 : vector<8x8xf32>
    %22 = vector.extract_strided_slice %13 {offsets = [1, 0], sizes = [8, 16], strides = [1, 1]} : vector<9x16xbf16> to vector<8x16xbf16>
    %cst_20 = arith.constant dense<0.000000e+00> : vector<8x8xf32>
    %23 = tpu.matmul %22, %7, %cst_20 {dimension_numbers = #tpu.dot_dimension_numbers<[1], [0], [0], [1], [0, 0, 1, 1], [], []>} : vector<8x16xbf16>, vector<16x8xbf16>, vector<8x8xf32> -> vector<8x8xf32>
    %24 = arith.addf %21, %23 : vector<8x8xf32>
    %c0_21 = arith.constant 0 : index
    %c0_22 = arith.constant 0 : index
    %c0_23 = arith.constant 0 : index
    %c0_24 = arith.constant 0 : index
    %25 = vector.load %arg5[%c0_21, %c0_22, %c0_23, %c0_24] : memref<1x8x8x8xf32, #tpu.memory_space<vmem>>, vector<1x1x8x8xf32>
    %26 = vector.shape_cast %25 : vector<1x1x8x8xf32> to vector<8x8xf32>
    %27 = vector.shape_cast %24 : vector<8x8xf32> to vector<1x1x8x8xf32>
    tpu.vector_store %arg5[%c0_21, %c0_22, %c0_23, %c0_24], %27 {strides = array<i32>} : memref<1x8x8x8xf32, #tpu.memory_space<vmem>>, vector<1x1x8x8xf32>,
    %cst_25 = arith.constant dense<0.000000e+00> : vector<8xf32>
    %28 = vector.multi_reduction <add>, %24, %cst_25 [0] : vector<8x8xf32> to vector<8xf32>
    %29 = vector.shape_cast %28 : vector<8xf32> to vector<1x8xf32>
    %30 = arith.addf %8, %29 : vector<1x8xf32>
    %31 = arith.mulf %24, %24 : vector<8x8xf32>
    %cst_26 = arith.constant dense<0.000000e+00> : vector<8xf32>
    %32 = vector.multi_reduction <add>, %31, %cst_26 [0] : vector<8x8xf32> to vector<8xf32>
    %33 = vector.shape_cast %32 : vector<8xf32> to vector<1x8xf32>
    %34 = arith.addf %9, %33 : vector<1x8xf32>
    %c0_27 = arith.constant 0 : index
    %c2_28 = arith.constant 2 : index
    %c0_29 = arith.constant 0 : index
    %c0_30 = arith.constant 0 : index
    %35 = vector.load %arg2[%c0_27, %c2_28, %c0_29, %c0_30] : memref<1x8x9x16xbf16, #tpu.memory_space<vmem>>, vector<1x1x9x16xbf16>
    %36 = vector.shape_cast %35 : vector<1x1x9x16xbf16> to vector<9x16xbf16>
    %37 = vector.extract_strided_slice %13 {offsets = [0, 0], sizes = [8, 16], strides = [1, 1]} : vector<9x16xbf16> to vector<8x16xbf16>
    %cst_31 = arith.constant dense<0.000000e+00> : vector<8x8xf32>
    %38 = tpu.matmul %37, %1, %cst_31 {dimension_numbers = #tpu.dot_dimension_numbers<[1], [0], [0], [1], [0, 0, 1, 1], [], []>} : vector<8x16xbf16>, vector<16x8xbf16>, vector<8x8xf32> -> vector<8x8xf32>
    %39 = vector.extract_strided_slice %13 {offsets = [1, 0], sizes = [8, 16], strides = [1, 1]} : vector<9x16xbf16> to vector<8x16xbf16>
    %cst_32 = arith.constant dense<0.000000e+00> : vector<8x8xf32>
    %40 = tpu.matmul %39, %3, %cst_32 {dimension_numbers = #tpu.dot_dimension_numbers<[1], [0], [0], [1], [0, 0, 1, 1], [], []>} : vector<8x16xbf16>, vector<16x8xbf16>, vector<8x8xf32> -> vector<8x8xf32>
    %41 = arith.addf %38, %40 : vector<8x8xf32>
    %42 = vector.extract_strided_slice %36 {offsets = [0, 0], sizes = [8, 16], strides = [1, 1]} : vector<9x16xbf16> to vector<8x16xbf16>
    %cst_33 = arith.constant dense<0.000000e+00> : vector<8x8xf32>
    %43 = tpu.matmul %42, %5, %cst_33 {dimension_numbers = #tpu.dot_dimension_numbers<[1], [0], [0], [1], [0, 0, 1, 1], [], []>} : vector<8x16xbf16>, vector<16x8xbf16>, vector<8x8xf32> -> vector<8x8xf32>
    %44 = arith.addf %41, %43 : vector<8x8xf32>
    %45 = vector.extract_strided_slice %36 {offsets = [1, 0], sizes = [8, 16], strides = [1, 1]} : vector<9x16xbf16> to vector<8x16xbf16>
    %cst_34 = arith.constant dense<0.000000e+00> : vector<8x8xf32>
    %46 = tpu.matmul %45, %7, %cst_34 {dimension_numbers = #tpu.dot_dimension_numbers<[1], [0], [0], [1], [0, 0, 1, 1], [], []>} : vector<8x16xbf16>, vector<16x8xbf16>, vector<8x8xf32> -> vector<8x8xf32>
    %47 = arith.addf %44, %46 : vector<8x8xf32>
    %c0_35 = arith.constant 0 : index
    %c1_36 = arith.constant 1 : index
    %c0_37 = arith.constant 0 : index
    %c0_38 = arith.constant 0 : index
    %48 = vector.load %arg5[%c0_35, %c1_36, %c0_37, %c0_38] : memref<1x8x8x8xf32, #tpu.memory_space<vmem>>, vector<1x1x8x8xf32>
    %49 = vector.shape_cast %48 : vector<1x1x8x8xf32> to vector<8x8xf32>
    %50 = vector.shape_cast %47 : vector<8x8xf32> to vector<1x1x8x8xf32>
    tpu.vector_store %arg5[%c0_35, %c1_36, %c0_37, %c0_38], %50 {strides = array<i32>} : memref<1x8x8x8xf32, #tpu.memory_space<vmem>>, vector<1x1x8x8xf32>,
    %cst_39 = arith.constant dense<0.000000e+00> : vector<8xf32>
    %51 = vector.multi_reduction <add>, %47, %cst_39 [0] : vector<8x8xf32> to vector<8xf32>
    %52 = vector.shape_cast %51 : vector<8xf32> to vector<1x8xf32>
    %53 = arith.addf %30, %52 : vector<1x8xf32>
    %54 = arith.mulf %47, %47 : vector<8x8xf32>
    %cst_40 = arith.constant dense<0.000000e+00> : vector<8xf32>
    %55 = vector.multi_reduction <add>, %54, %cst_40 [0] : vector<8x8xf32> to vector<8xf32>
    %56 = vector.shape_cast %55 : vector<8xf32> to vector<1x8xf32>
    %57 = arith.addf %34, %56 : vector<1x8xf32>
    %c0_41 = arith.constant 0 : index
    %c3_42 = arith.constant 3 : index
    %c0_43 = arith.constant 0 : index
    %c0_44 = arith.constant 0 : index
    %58 = vector.load %arg2[%c0_41, %c3_42, %c0_43, %c0_44] : memref<1x8x9x16xbf16, #tpu.memory_space<vmem>>, vector<1x1x9x16xbf16>
    %59 = vector.shape_cast %58 : vector<1x1x9x16xbf16> to vector<9x16xbf16>
    %60 = vector.extract_strided_slice %36 {offsets = [0, 0], sizes = [8, 16], strides = [1, 1]} : vector<9x16xbf16> to vector<8x16xbf16>
    %cst_45 = arith.constant dense<0.000000e+00> : vector<8x8xf32>
    %61 = tpu.matmul %60, %1, %cst_45 {dimension_numbers = #tpu.dot_dimension_numbers<[1], [0], [0], [1], [0, 0, 1, 1], [], []>} : vector<8x16xbf16>, vector<16x8xbf16>, vector<8x8xf32> -> vector<8x8xf32>
    %62 = vector.extract_strided_slice %36 {offsets = [1, 0], sizes = [8, 16], strides = [1, 1]} : vector<9x16xbf16> to vector<8x16xbf16>
    %cst_46 = arith.constant dense<0.000000e+00> : vector<8x8xf32>
    %63 = tpu.matmul %62, %3, %cst_46 {dimension_numbers = #tpu.dot_dimension_numbers<[1], [0], [0], [1], [0, 0, 1, 1], [], []>} : vector<8x16xbf16>, vector<16x8xbf16>, vector<8x8xf32> -> vector<8x8xf32>
    %64 = arith.addf %61, %63 : vector<8x8xf32>
    %65 = vector.extract_strided_slice %59 {offsets = [0, 0], sizes = [8, 16], strides = [1, 1]} : vector<9x16xbf16> to vector<8x16xbf16>
    %cst_47 = arith.constant dense<0.000000e+00> : vector<8x8xf32>
    %66 = tpu.matmul %65, %5, %cst_47 {dimension_numbers = #tpu.dot_dimension_numbers<[1], [0], [0], [1], [0, 0, 1, 1], [], []>} : vector<8x16xbf16>, vector<16x8xbf16>, vector<8x8xf32> -> vector<8x8xf32>
    %67 = arith.addf %64, %66 : vector<8x8xf32>
    %68 = vector.extract_strided_slice %59 {offsets = [1, 0], sizes = [8, 16], strides = [1, 1]} : vector<9x16xbf16> to vector<8x16xbf16>
    %cst_48 = arith.constant dense<0.000000e+00> : vector<8x8xf32>
    %69 = tpu.matmul %68, %7, %cst_48 {dimension_numbers = #tpu.dot_dimension_numbers<[1], [0], [0], [1], [0, 0, 1, 1], [], []>} : vector<8x16xbf16>, vector<16x8xbf16>, vector<8x8xf32> -> vector<8x8xf32>
    %70 = arith.addf %67, %69 : vector<8x8xf32>
    %c0_49 = arith.constant 0 : index
    %c2_50 = arith.constant 2 : index
    %c0_51 = arith.constant 0 : index
    %c0_52 = arith.constant 0 : index
    %71 = vector.load %arg5[%c0_49, %c2_50, %c0_51, %c0_52] : memref<1x8x8x8xf32, #tpu.memory_space<vmem>>, vector<1x1x8x8xf32>
    %72 = vector.shape_cast %71 : vector<1x1x8x8xf32> to vector<8x8xf32>
    %73 = vector.shape_cast %70 : vector<8x8xf32> to vector<1x1x8x8xf32>
    tpu.vector_store %arg5[%c0_49, %c2_50, %c0_51, %c0_52], %73 {strides = array<i32>} : memref<1x8x8x8xf32, #tpu.memory_space<vmem>>, vector<1x1x8x8xf32>,
    %cst_53 = arith.constant dense<0.000000e+00> : vector<8xf32>
    %74 = vector.multi_reduction <add>, %70, %cst_53 [0] : vector<8x8xf32> to vector<8xf32>
    %75 = vector.shape_cast %74 : vector<8xf32> to vector<1x8xf32>
    %76 = arith.addf %53, %75 : vector<1x8xf32>
    %77 = arith.mulf %70, %70 : vector<8x8xf32>
    %cst_54 = arith.constant dense<0.000000e+00> : vector<8xf32>
    %78 = vector.multi_reduction <add>, %77, %cst_54 [0] : vector<8x8xf32> to vector<8xf32>
    %79 = vector.shape_cast %78 : vector<8xf32> to vector<1x8xf32>
    %80 = arith.addf %57, %79 : vector<1x8xf32>
    %c0_55 = arith.constant 0 : index
    %c4 = arith.constant 4 : index
    %c0_56 = arith.constant 0 : index
    %c0_57 = arith.constant 0 : index
    %81 = vector.load %arg2[%c0_55, %c4, %c0_56, %c0_57] : memref<1x8x9x16xbf16, #tpu.memory_space<vmem>>, vector<1x1x9x16xbf16>
    %82 = vector.shape_cast %81 : vector<1x1x9x16xbf16> to vector<9x16xbf16>
    %83 = vector.extract_strided_slice %59 {offsets = [0, 0], sizes = [8, 16], strides = [1, 1]} : vector<9x16xbf16> to vector<8x16xbf16>
    %cst_58 = arith.constant dense<0.000000e+00> : vector<8x8xf32>
    %84 = tpu.matmul %83, %1, %cst_58 {dimension_numbers = #tpu.dot_dimension_numbers<[1], [0], [0], [1], [0, 0, 1, 1], [], []>} : vector<8x16xbf16>, vector<16x8xbf16>, vector<8x8xf32> -> vector<8x8xf32>
    %85 = vector.extract_strided_slice %59 {offsets = [1, 0], sizes = [8, 16], strides = [1, 1]} : vector<9x16xbf16> to vector<8x16xbf16>
    %cst_59 = arith.constant dense<0.000000e+00> : vector<8x8xf32>
    %86 = tpu.matmul %85, %3, %cst_59 {dimension_numbers = #tpu.dot_dimension_numbers<[1], [0], [0], [1], [0, 0, 1, 1], [], []>} : vector<8x16xbf16>, vector<16x8xbf16>, vector<8x8xf32> -> vector<8x8xf32>
    %87 = arith.addf %84, %86 : vector<8x8xf32>
    %88 = vector.extract_strided_slice %82 {offsets = [0, 0], sizes = [8, 16], strides = [1, 1]} : vector<9x16xbf16> to vector<8x16xbf16>
    %cst_60 = arith.constant dense<0.000000e+00> : vector<8x8xf32>
    %89 = tpu.matmul %88, %5, %cst_60 {dimension_numbers = #tpu.dot_dimension_numbers<[1], [0], [0], [1], [0, 0, 1, 1], [], []>} : vector<8x16xbf16>, vector<16x8xbf16>, vector<8x8xf32> -> vector<8x8xf32>
    %90 = arith.addf %87, %89 : vector<8x8xf32>
    %91 = vector.extract_strided_slice %82 {offsets = [1, 0], sizes = [8, 16], strides = [1, 1]} : vector<9x16xbf16> to vector<8x16xbf16>
    %cst_61 = arith.constant dense<0.000000e+00> : vector<8x8xf32>
    %92 = tpu.matmul %91, %7, %cst_61 {dimension_numbers = #tpu.dot_dimension_numbers<[1], [0], [0], [1], [0, 0, 1, 1], [], []>} : vector<8x16xbf16>, vector<16x8xbf16>, vector<8x8xf32> -> vector<8x8xf32>
    %93 = arith.addf %90, %92 : vector<8x8xf32>
    %c0_62 = arith.constant 0 : index
    %c3_63 = arith.constant 3 : index
    %c0_64 = arith.constant 0 : index
    %c0_65 = arith.constant 0 : index
    %94 = vector.load %arg5[%c0_62, %c3_63, %c0_64, %c0_65] : memref<1x8x8x8xf32, #tpu.memory_space<vmem>>, vector<1x1x8x8xf32>
    %95 = vector.shape_cast %94 : vector<1x1x8x8xf32> to vector<8x8xf32>
    %96 = vector.shape_cast %93 : vector<8x8xf32> to vector<1x1x8x8xf32>
    tpu.vector_store %arg5[%c0_62, %c3_63, %c0_64, %c0_65], %96 {strides = array<i32>} : memref<1x8x8x8xf32, #tpu.memory_space<vmem>>, vector<1x1x8x8xf32>,
    %cst_66 = arith.constant dense<0.000000e+00> : vector<8xf32>
    %97 = vector.multi_reduction <add>, %93, %cst_66 [0] : vector<8x8xf32> to vector<8xf32>
    %98 = vector.shape_cast %97 : vector<8xf32> to vector<1x8xf32>
    %99 = arith.addf %76, %98 : vector<1x8xf32>
    %100 = arith.mulf %93, %93 : vector<8x8xf32>
    %cst_67 = arith.constant dense<0.000000e+00> : vector<8xf32>
    %101 = vector.multi_reduction <add>, %100, %cst_67 [0] : vector<8x8xf32> to vector<8xf32>
    %102 = vector.shape_cast %101 : vector<8xf32> to vector<1x8xf32>
    %103 = arith.addf %80, %102 : vector<1x8xf32>
    %c0_68 = arith.constant 0 : index
    %c5 = arith.constant 5 : index
    %c0_69 = arith.constant 0 : index
    %c0_70 = arith.constant 0 : index
    %104 = vector.load %arg2[%c0_68, %c5, %c0_69, %c0_70] : memref<1x8x9x16xbf16, #tpu.memory_space<vmem>>, vector<1x1x9x16xbf16>
    %105 = vector.shape_cast %104 : vector<1x1x9x16xbf16> to vector<9x16xbf16>
    %106 = vector.extract_strided_slice %82 {offsets = [0, 0], sizes = [8, 16], strides = [1, 1]} : vector<9x16xbf16> to vector<8x16xbf16>
    %cst_71 = arith.constant dense<0.000000e+00> : vector<8x8xf32>
    %107 = tpu.matmul %106, %1, %cst_71 {dimension_numbers = #tpu.dot_dimension_numbers<[1], [0], [0], [1], [0, 0, 1, 1], [], []>} : vector<8x16xbf16>, vector<16x8xbf16>, vector<8x8xf32> -> vector<8x8xf32>
    %108 = vector.extract_strided_slice %82 {offsets = [1, 0], sizes = [8, 16], strides = [1, 1]} : vector<9x16xbf16> to vector<8x16xbf16>
    %cst_72 = arith.constant dense<0.000000e+00> : vector<8x8xf32>
    %109 = tpu.matmul %108, %3, %cst_72 {dimension_numbers = #tpu.dot_dimension_numbers<[1], [0], [0], [1], [0, 0, 1, 1], [], []>} : vector<8x16xbf16>, vector<16x8xbf16>, vector<8x8xf32> -> vector<8x8xf32>
    %110 = arith.addf %107, %109 : vector<8x8xf32>
    %111 = vector.extract_strided_slice %105 {offsets = [0, 0], sizes = [8, 16], strides = [1, 1]} : vector<9x16xbf16> to vector<8x16xbf16>
    %cst_73 = arith.constant dense<0.000000e+00> : vector<8x8xf32>
    %112 = tpu.matmul %111, %5, %cst_73 {dimension_numbers = #tpu.dot_dimension_numbers<[1], [0], [0], [1], [0, 0, 1, 1], [], []>} : vector<8x16xbf16>, vector<16x8xbf16>, vector<8x8xf32> -> vector<8x8xf32>
    %113 = arith.addf %110, %112 : vector<8x8xf32>
    %114 = vector.extract_strided_slice %105 {offsets = [1, 0], sizes = [8, 16], strides = [1, 1]} : vector<9x16xbf16> to vector<8x16xbf16>
    %cst_74 = arith.constant dense<0.000000e+00> : vector<8x8xf32>
    %115 = tpu.matmul %114, %7, %cst_74 {dimension_numbers = #tpu.dot_dimension_numbers<[1], [0], [0], [1], [0, 0, 1, 1], [], []>} : vector<8x16xbf16>, vector<16x8xbf16>, vector<8x8xf32> -> vector<8x8xf32>
    %116 = arith.addf %113, %115 : vector<8x8xf32>
    %c0_75 = arith.constant 0 : index
    %c4_76 = arith.constant 4 : index
    %c0_77 = arith.constant 0 : index
    %c0_78 = arith.constant 0 : index
    %117 = vector.load %arg5[%c0_75, %c4_76, %c0_77, %c0_78] : memref<1x8x8x8xf32, #tpu.memory_space<vmem>>, vector<1x1x8x8xf32>
    %118 = vector.shape_cast %117 : vector<1x1x8x8xf32> to vector<8x8xf32>
    %119 = vector.shape_cast %116 : vector<8x8xf32> to vector<1x1x8x8xf32>
    tpu.vector_store %arg5[%c0_75, %c4_76, %c0_77, %c0_78], %119 {strides = array<i32>} : memref<1x8x8x8xf32, #tpu.memory_space<vmem>>, vector<1x1x8x8xf32>,
    %cst_79 = arith.constant dense<0.000000e+00> : vector<8xf32>
    %120 = vector.multi_reduction <add>, %116, %cst_79 [0] : vector<8x8xf32> to vector<8xf32>
    %121 = vector.shape_cast %120 : vector<8xf32> to vector<1x8xf32>
    %122 = arith.addf %99, %121 : vector<1x8xf32>
    %123 = arith.mulf %116, %116 : vector<8x8xf32>
    %cst_80 = arith.constant dense<0.000000e+00> : vector<8xf32>
    %124 = vector.multi_reduction <add>, %123, %cst_80 [0] : vector<8x8xf32> to vector<8xf32>
    %125 = vector.shape_cast %124 : vector<8xf32> to vector<1x8xf32>
    %126 = arith.addf %103, %125 : vector<1x8xf32>
    %c0_81 = arith.constant 0 : index
    %c6 = arith.constant 6 : index
    %c0_82 = arith.constant 0 : index
    %c0_83 = arith.constant 0 : index
    %127 = vector.load %arg2[%c0_81, %c6, %c0_82, %c0_83] : memref<1x8x9x16xbf16, #tpu.memory_space<vmem>>, vector<1x1x9x16xbf16>
    %128 = vector.shape_cast %127 : vector<1x1x9x16xbf16> to vector<9x16xbf16>
    %129 = vector.extract_strided_slice %105 {offsets = [0, 0], sizes = [8, 16], strides = [1, 1]} : vector<9x16xbf16> to vector<8x16xbf16>
    %cst_84 = arith.constant dense<0.000000e+00> : vector<8x8xf32>
    %130 = tpu.matmul %129, %1, %cst_84 {dimension_numbers = #tpu.dot_dimension_numbers<[1], [0], [0], [1], [0, 0, 1, 1], [], []>} : vector<8x16xbf16>, vector<16x8xbf16>, vector<8x8xf32> -> vector<8x8xf32>
    %131 = vector.extract_strided_slice %105 {offsets = [1, 0], sizes = [8, 16], strides = [1, 1]} : vector<9x16xbf16> to vector<8x16xbf16>
    %cst_85 = arith.constant dense<0.000000e+00> : vector<8x8xf32>
    %132 = tpu.matmul %131, %3, %cst_85 {dimension_numbers = #tpu.dot_dimension_numbers<[1], [0], [0], [1], [0, 0, 1, 1], [], []>} : vector<8x16xbf16>, vector<16x8xbf16>, vector<8x8xf32> -> vector<8x8xf32>
    %133 = arith.addf %130, %132 : vector<8x8xf32>
    %134 = vector.extract_strided_slice %128 {offsets = [0, 0], sizes = [8, 16], strides = [1, 1]} : vector<9x16xbf16> to vector<8x16xbf16>
    %cst_86 = arith.constant dense<0.000000e+00> : vector<8x8xf32>
    %135 = tpu.matmul %134, %5, %cst_86 {dimension_numbers = #tpu.dot_dimension_numbers<[1], [0], [0], [1], [0, 0, 1, 1], [], []>} : vector<8x16xbf16>, vector<16x8xbf16>, vector<8x8xf32> -> vector<8x8xf32>
    %136 = arith.addf %133, %135 : vector<8x8xf32>
    %137 = vector.extract_strided_slice %128 {offsets = [1, 0], sizes = [8, 16], strides = [1, 1]} : vector<9x16xbf16> to vector<8x16xbf16>
    %cst_87 = arith.constant dense<0.000000e+00> : vector<8x8xf32>
    %138 = tpu.matmul %137, %7, %cst_87 {dimension_numbers = #tpu.dot_dimension_numbers<[1], [0], [0], [1], [0, 0, 1, 1], [], []>} : vector<8x16xbf16>, vector<16x8xbf16>, vector<8x8xf32> -> vector<8x8xf32>
    %139 = arith.addf %136, %138 : vector<8x8xf32>
    %c0_88 = arith.constant 0 : index
    %c5_89 = arith.constant 5 : index
    %c0_90 = arith.constant 0 : index
    %c0_91 = arith.constant 0 : index
    %140 = vector.load %arg5[%c0_88, %c5_89, %c0_90, %c0_91] : memref<1x8x8x8xf32, #tpu.memory_space<vmem>>, vector<1x1x8x8xf32>
    %141 = vector.shape_cast %140 : vector<1x1x8x8xf32> to vector<8x8xf32>
    %142 = vector.shape_cast %139 : vector<8x8xf32> to vector<1x1x8x8xf32>
    tpu.vector_store %arg5[%c0_88, %c5_89, %c0_90, %c0_91], %142 {strides = array<i32>} : memref<1x8x8x8xf32, #tpu.memory_space<vmem>>, vector<1x1x8x8xf32>,
    %cst_92 = arith.constant dense<0.000000e+00> : vector<8xf32>
    %143 = vector.multi_reduction <add>, %139, %cst_92 [0] : vector<8x8xf32> to vector<8xf32>
    %144 = vector.shape_cast %143 : vector<8xf32> to vector<1x8xf32>
    %145 = arith.addf %122, %144 : vector<1x8xf32>
    %146 = arith.mulf %139, %139 : vector<8x8xf32>
    %cst_93 = arith.constant dense<0.000000e+00> : vector<8xf32>
    %147 = vector.multi_reduction <add>, %146, %cst_93 [0] : vector<8x8xf32> to vector<8xf32>
    %148 = vector.shape_cast %147 : vector<8xf32> to vector<1x8xf32>
    %149 = arith.addf %126, %148 : vector<1x8xf32>
    %c0_94 = arith.constant 0 : index
    %c7 = arith.constant 7 : index
    %c0_95 = arith.constant 0 : index
    %c0_96 = arith.constant 0 : index
    %150 = vector.load %arg2[%c0_94, %c7, %c0_95, %c0_96] : memref<1x8x9x16xbf16, #tpu.memory_space<vmem>>, vector<1x1x9x16xbf16>
    %151 = vector.shape_cast %150 : vector<1x1x9x16xbf16> to vector<9x16xbf16>
    %152 = vector.extract_strided_slice %128 {offsets = [0, 0], sizes = [8, 16], strides = [1, 1]} : vector<9x16xbf16> to vector<8x16xbf16>
    %cst_97 = arith.constant dense<0.000000e+00> : vector<8x8xf32>
    %153 = tpu.matmul %152, %1, %cst_97 {dimension_numbers = #tpu.dot_dimension_numbers<[1], [0], [0], [1], [0, 0, 1, 1], [], []>} : vector<8x16xbf16>, vector<16x8xbf16>, vector<8x8xf32> -> vector<8x8xf32>
    %154 = vector.extract_strided_slice %128 {offsets = [1, 0], sizes = [8, 16], strides = [1, 1]} : vector<9x16xbf16> to vector<8x16xbf16>
    %cst_98 = arith.constant dense<0.000000e+00> : vector<8x8xf32>
    %155 = tpu.matmul %154, %3, %cst_98 {dimension_numbers = #tpu.dot_dimension_numbers<[1], [0], [0], [1], [0, 0, 1, 1], [], []>} : vector<8x16xbf16>, vector<16x8xbf16>, vector<8x8xf32> -> vector<8x8xf32>
    %156 = arith.addf %153, %155 : vector<8x8xf32>
    %157 = vector.extract_strided_slice %151 {offsets = [0, 0], sizes = [8, 16], strides = [1, 1]} : vector<9x16xbf16> to vector<8x16xbf16>
    %cst_99 = arith.constant dense<0.000000e+00> : vector<8x8xf32>
    %158 = tpu.matmul %157, %5, %cst_99 {dimension_numbers = #tpu.dot_dimension_numbers<[1], [0], [0], [1], [0, 0, 1, 1], [], []>} : vector<8x16xbf16>, vector<16x8xbf16>, vector<8x8xf32> -> vector<8x8xf32>
    %159 = arith.addf %156, %158 : vector<8x8xf32>
    %160 = vector.extract_strided_slice %151 {offsets = [1, 0], sizes = [8, 16], strides = [1, 1]} : vector<9x16xbf16> to vector<8x16xbf16>
    %cst_100 = arith.constant dense<0.000000e+00> : vector<8x8xf32>
    %161 = tpu.matmul %160, %7, %cst_100 {dimension_numbers = #tpu.dot_dimension_numbers<[1], [0], [0], [1], [0, 0, 1, 1], [], []>} : vector<8x16xbf16>, vector<16x8xbf16>, vector<8x8xf32> -> vector<8x8xf32>
    %162 = arith.addf %159, %161 : vector<8x8xf32>
    %c0_101 = arith.constant 0 : index
    %c6_102 = arith.constant 6 : index
    %c0_103 = arith.constant 0 : index
    %c0_104 = arith.constant 0 : index
    %163 = vector.load %arg5[%c0_101, %c6_102, %c0_103, %c0_104] : memref<1x8x8x8xf32, #tpu.memory_space<vmem>>, vector<1x1x8x8xf32>
    %164 = vector.shape_cast %163 : vector<1x1x8x8xf32> to vector<8x8xf32>
    %165 = vector.shape_cast %162 : vector<8x8xf32> to vector<1x1x8x8xf32>
    tpu.vector_store %arg5[%c0_101, %c6_102, %c0_103, %c0_104], %165 {strides = array<i32>} : memref<1x8x8x8xf32, #tpu.memory_space<vmem>>, vector<1x1x8x8xf32>,
    %cst_105 = arith.constant dense<0.000000e+00> : vector<8xf32>
    %166 = vector.multi_reduction <add>, %162, %cst_105 [0] : vector<8x8xf32> to vector<8xf32>
    %167 = vector.shape_cast %166 : vector<8xf32> to vector<1x8xf32>
    %168 = arith.addf %145, %167 : vector<1x8xf32>
    %169 = arith.mulf %162, %162 : vector<8x8xf32>
    %cst_106 = arith.constant dense<0.000000e+00> : vector<8xf32>
    %170 = vector.multi_reduction <add>, %169, %cst_106 [0] : vector<8x8xf32> to vector<8xf32>
    %171 = vector.shape_cast %170 : vector<8xf32> to vector<1x8xf32>
    %172 = arith.addf %149, %171 : vector<1x8xf32>
    %c0_107 = arith.constant 0 : index
    %c0_108 = arith.constant 0 : index
    %c0_109 = arith.constant 0 : index
    %c0_110 = arith.constant 0 : index
    %173 = vector.load %arg3[%c0_107, %c0_108, %c0_109, %c0_110] : memref<1x1x9x16xbf16, #tpu.memory_space<vmem>>, vector<1x1x9x16xbf16>
    %174 = vector.shape_cast %173 : vector<1x1x9x16xbf16> to vector<9x16xbf16>
    %175 = vector.extract_strided_slice %151 {offsets = [0, 0], sizes = [8, 16], strides = [1, 1]} : vector<9x16xbf16> to vector<8x16xbf16>
    %cst_111 = arith.constant dense<0.000000e+00> : vector<8x8xf32>
    %176 = tpu.matmul %175, %1, %cst_111 {dimension_numbers = #tpu.dot_dimension_numbers<[1], [0], [0], [1], [0, 0, 1, 1], [], []>} : vector<8x16xbf16>, vector<16x8xbf16>, vector<8x8xf32> -> vector<8x8xf32>
    %177 = vector.extract_strided_slice %151 {offsets = [1, 0], sizes = [8, 16], strides = [1, 1]} : vector<9x16xbf16> to vector<8x16xbf16>
    %cst_112 = arith.constant dense<0.000000e+00> : vector<8x8xf32>
    %178 = tpu.matmul %177, %3, %cst_112 {dimension_numbers = #tpu.dot_dimension_numbers<[1], [0], [0], [1], [0, 0, 1, 1], [], []>} : vector<8x16xbf16>, vector<16x8xbf16>, vector<8x8xf32> -> vector<8x8xf32>
    %179 = arith.addf %176, %178 : vector<8x8xf32>
    %180 = vector.extract_strided_slice %174 {offsets = [0, 0], sizes = [8, 16], strides = [1, 1]} : vector<9x16xbf16> to vector<8x16xbf16>
    %cst_113 = arith.constant dense<0.000000e+00> : vector<8x8xf32>
    %181 = tpu.matmul %180, %5, %cst_113 {dimension_numbers = #tpu.dot_dimension_numbers<[1], [0], [0], [1], [0, 0, 1, 1], [], []>} : vector<8x16xbf16>, vector<16x8xbf16>, vector<8x8xf32> -> vector<8x8xf32>
    %182 = arith.addf %179, %181 : vector<8x8xf32>
    %183 = vector.extract_strided_slice %174 {offsets = [1, 0], sizes = [8, 16], strides = [1, 1]} : vector<9x16xbf16> to vector<8x16xbf16>
    %cst_114 = arith.constant dense<0.000000e+00> : vector<8x8xf32>
    %184 = tpu.matmul %183, %7, %cst_114 {dimension_numbers = #tpu.dot_dimension_numbers<[1], [0], [0], [1], [0, 0, 1, 1], [], []>} : vector<8x16xbf16>, vector<16x8xbf16>, vector<8x8xf32> -> vector<8x8xf32>
    %185 = arith.addf %182, %184 : vector<8x8xf32>
    %c0_115 = arith.constant 0 : index
    %c7_116 = arith.constant 7 : index
    %c0_117 = arith.constant 0 : index
    %c0_118 = arith.constant 0 : index
    %186 = vector.load %arg5[%c0_115, %c7_116, %c0_117, %c0_118] : memref<1x8x8x8xf32, #tpu.memory_space<vmem>>, vector<1x1x8x8xf32>
    %187 = vector.shape_cast %186 : vector<1x1x8x8xf32> to vector<8x8xf32>
    %188 = vector.shape_cast %185 : vector<8x8xf32> to vector<1x1x8x8xf32>
    tpu.vector_store %arg5[%c0_115, %c7_116, %c0_117, %c0_118], %188 {strides = array<i32>} : memref<1x8x8x8xf32, #tpu.memory_space<vmem>>, vector<1x1x8x8xf32>,
    %cst_119 = arith.constant dense<0.000000e+00> : vector<8xf32>
    %189 = vector.multi_reduction <add>, %185, %cst_119 [0] : vector<8x8xf32> to vector<8xf32>
    %190 = vector.shape_cast %189 : vector<8xf32> to vector<1x8xf32>
    %191 = arith.addf %168, %190 : vector<1x8xf32>
    %192 = arith.mulf %185, %185 : vector<8x8xf32>
    %cst_120 = arith.constant dense<0.000000e+00> : vector<8xf32>
    %193 = vector.multi_reduction <add>, %192, %cst_120 [0] : vector<8x8xf32> to vector<8xf32>
    %194 = vector.shape_cast %193 : vector<8xf32> to vector<1x8xf32>
    %195 = arith.addf %172, %194 : vector<1x8xf32>
    %c0_121 = arith.constant 0 : index
    %c0_122 = arith.constant 0 : index
    %c0_123 = arith.constant 0 : index
    %c0_124 = arith.constant 0 : index
    %196 = vector.load %arg6[%c0_121, %c0_122, %c0_123, %c0_124] : memref<1x1x2x8xf32, #tpu.memory_space<vmem>>, vector<1x1x1x8xf32>
    %197 = vector.shape_cast %196 : vector<1x1x1x8xf32> to vector<1x8xf32>
    %198 = vector.shape_cast %191 : vector<1x8xf32> to vector<1x1x1x8xf32>
    tpu.vector_store %arg6[%c0_121, %c0_122, %c0_123, %c0_124], %198 {strides = array<i32>} : memref<1x1x2x8xf32, #tpu.memory_space<vmem>>, vector<1x1x1x8xf32>,
    %c0_125 = arith.constant 0 : index
    %c0_126 = arith.constant 0 : index
    %c1_127 = arith.constant 1 : index
    %c0_128 = arith.constant 0 : index
    %199 = vector.load %arg6[%c0_125, %c0_126, %c1_127, %c0_128] : memref<1x1x2x8xf32, #tpu.memory_space<vmem>>, vector<1x1x1x8xf32>
    %200 = vector.shape_cast %199 : vector<1x1x1x8xf32> to vector<1x8xf32>
    %201 = vector.shape_cast %195 : vector<1x8xf32> to vector<1x1x1x8xf32>
    tpu.vector_store %arg6[%c0_125, %c0_126, %c1_127, %c0_128], %201 {strides = array<i32>} : memref<1x1x2x8xf32, #tpu.memory_space<vmem>>, vector<1x1x1x8xf32>,
    return
  }
  func.func @transform_0(%arg0: i32, %arg1: i32) -> (i32, i32, i32, i32) {
    %c0_i32 = arith.constant 0 : i32
    %c0_i32_0 = arith.constant 0 : i32
    %c0_i32_1 = arith.constant 0 : i32
    return %arg0, %arg1, %c0_i32, %c0_i32_0 : i32, i32, i32, i32
  }
  func.func @transform_1(%arg0: i32, %arg1: i32) -> (i32, i32, i32, i32) {
    %c8_i32 = arith.constant 8 : i32
    %0 = arith.muli %arg1, %c8_i32 : i32
    %c8_i32_0 = arith.constant 8 : i32
    %1 = arith.addi %0, %c8_i32_0 : i32
    %c0_i32 = arith.constant 0 : i32
    %c0_i32_1 = arith.constant 0 : i32
    %c0_i32_2 = arith.constant 0 : i32
    return %arg0, %1, %c0_i32, %c0_i32_1 : i32, i32, i32, i32
  }
  func.func @transform_2(%arg0: i32, %arg1: i32) -> (i32, i32, i32) {
    %c0_i32 = arith.constant 0 : i32
    %c0_i32_0 = arith.constant 0 : i32
    %c0_i32_1 = arith.constant 0 : i32
    %c0_i32_2 = arith.constant 0 : i32
    return %c0_i32, %c0_i32_0, %c0_i32_1 : i32, i32, i32
  }
  func.func @transform_3(%arg0: i32, %arg1: i32) -> (i32, i32, i32, i32) {
    %c0_i32 = arith.constant 0 : i32
    %c0_i32_0 = arith.constant 0 : i32
    %c0_i32_1 = arith.constant 0 : i32
    return %arg0, %arg1, %c0_i32, %c0_i32_0 : i32, i32, i32, i32
  }
  func.func @transform_4(%arg0: i32, %arg1: i32) -> (i32, i32, i32, i32) {
    %c0_i32 = arith.constant 0 : i32
    %c0_i32_0 = arith.constant 0 : i32
    %c0_i32_1 = arith.constant 0 : i32
    return %arg0, %arg1, %c0_i32, %c0_i32_0 : i32, i32, i32, i32
  }
}

module attributes {stable_mosaic.version = 11 : i64} {
  func.func @_bn_lrelu_kernel(%arg0: i32, %arg1: i32, %arg2: memref<1x8x8x8xf32, #tpu.memory_space<vmem>>, %arg3: memref<1x8xf32, #tpu.memory_space<vmem>>, %arg4: memref<1x8xf32, #tpu.memory_space<vmem>>, %arg5: memref<1x8x8x8xf32, #tpu.memory_space<vmem>>) attributes {dimension_semantics = [#tpu.dimension_semantics<parallel>, #tpu.dimension_semantics<parallel>], iteration_bounds = array<i64: 2, 1>, scalar_prefetch = 0 : i64, scratch_operands = 0 : i64, tpu.core_type = #tpu.core_type<tc>, window_params = [{transform_indices = @transform_0, window_bounds = array<i64: 1, 8, 8, 8>}, {pipeline_mode = #tpu.pipeline_mode<synchronous>, transform_indices = @transform_1, window_bounds = array<i64: 1, 8>}, {pipeline_mode = #tpu.pipeline_mode<synchronous>, transform_indices = @transform_2, window_bounds = array<i64: 1, 8>}, {transform_indices = @transform_3, window_bounds = array<i64: 1, 8, 8, 8>}]} {
    %c0 = arith.constant 0 : index
    %c0_0 = arith.constant 0 : index
    %c0_1 = arith.constant 0 : index
    %c0_2 = arith.constant 0 : index
    %0 = vector.load %arg2[%c0, %c0_0, %c0_1, %c0_2] : memref<1x8x8x8xf32, #tpu.memory_space<vmem>>, vector<1x8x8x8xf32>
    %c0_3 = arith.constant 0 : index
    %c0_4 = arith.constant 0 : index
    %1 = vector.load %arg3[%c0_3, %c0_4] : memref<1x8xf32, #tpu.memory_space<vmem>>, vector<1x8xf32>
    %2 = vector.shape_cast %1 : vector<1x8xf32> to vector<1x1x1x8xf32>
    %3 = vector.broadcast %2 : vector<1x1x1x8xf32> to vector<1x8x8x8xf32>
    %4 = arith.mulf %0, %3 : vector<1x8x8x8xf32>
    %c0_5 = arith.constant 0 : index
    %c0_6 = arith.constant 0 : index
    %5 = vector.load %arg4[%c0_5, %c0_6] : memref<1x8xf32, #tpu.memory_space<vmem>>, vector<1x8xf32>
    %6 = vector.shape_cast %5 : vector<1x8xf32> to vector<1x1x1x8xf32>
    %7 = vector.broadcast %6 : vector<1x1x1x8xf32> to vector<1x8x8x8xf32>
    %8 = arith.addf %4, %7 : vector<1x8x8x8xf32>
    %cst = arith.constant 0.000000e+00 : f32
    %9 = vector.broadcast %cst : f32 to vector<1x8x8x8xf32>
    %10 = arith.cmpf oge, %8, %9 : vector<1x8x8x8xf32>
    %cst_7 = arith.constant 2.000000e-01 : f32
    %11 = vector.broadcast %cst_7 : f32 to vector<1x8x8x8xf32>
    %12 = arith.mulf %11, %8 : vector<1x8x8x8xf32>
    %13 = arith.select %10, %8, %12 : vector<1x8x8x8xi1>, vector<1x8x8x8xf32>
    %c0_8 = arith.constant 0 : index
    %c0_9 = arith.constant 0 : index
    %c0_10 = arith.constant 0 : index
    %c0_11 = arith.constant 0 : index
    %14 = vector.load %arg5[%c0_8, %c0_9, %c0_10, %c0_11] : memref<1x8x8x8xf32, #tpu.memory_space<vmem>>, vector<1x8x8x8xf32>
    tpu.vector_store %arg5[%c0_8, %c0_9, %c0_10, %c0_11], %13 {strides = array<i32>} : memref<1x8x8x8xf32, #tpu.memory_space<vmem>>, vector<1x8x8x8xf32>,
    return
  }
  func.func @transform_0(%arg0: i32, %arg1: i32) -> (i32, i32, i32, i32) {
    %c0_i32 = arith.constant 0 : i32
    %c0_i32_0 = arith.constant 0 : i32
    %c0_i32_1 = arith.constant 0 : i32
    return %arg0, %arg1, %c0_i32, %c0_i32_0 : i32, i32, i32, i32
  }
  func.func @transform_1(%arg0: i32, %arg1: i32) -> (i32, i32) {
    %c0_i32 = arith.constant 0 : i32
    %c0_i32_0 = arith.constant 0 : i32
    %c0_i32_1 = arith.constant 0 : i32
    return %c0_i32, %c0_i32_0 : i32, i32
  }
  func.func @transform_2(%arg0: i32, %arg1: i32) -> (i32, i32) {
    %c0_i32 = arith.constant 0 : i32
    %c0_i32_0 = arith.constant 0 : i32
    %c0_i32_1 = arith.constant 0 : i32
    return %c0_i32, %c0_i32_0 : i32, i32
  }
  func.func @transform_3(%arg0: i32, %arg1: i32) -> (i32, i32, i32, i32) {
    %c0_i32 = arith.constant 0 : i32
    %c0_i32_0 = arith.constant 0 : i32
    %c0_i32_1 = arith.constant 0 : i32
    return %arg0, %arg1, %c0_i32, %c0_i32_0 : i32, i32, i32, i32
  }
}

</mosaic_0001>

<bundles_post_ra>
// kernel: downsampler_forward.3
= control target key start
LH: loop header
LB: loop body
LE: loop exit
PB: predicated region body
PF: predicated region fallthrough
CT: control target
= control target key end

     0   :  { %s451_s12 = smov 0   ;;  %s453_s13 = smov 0   ;;  %s511_s0 = inlined_call_operand.vmem [shape: f32[2,8,8,8], index: 0, kind: input, shape index: {}, may-alias: {0,3}]   ;;  %s512_s1 = inlined_call_operand.vmem [shape: f32[1,8], index: 1, kind: input, shape index: {}]   ;;  %s513_s2 = inlined_call_operand.vmem [shape: f32[1,8], index: 2, kind: input, shape index: {}]   ;;  %s514_s3 = inlined_call_operand.vmem [shape: f32[2,8,8,8], index: 3, kind: output, shape index: {}, may-alias: {0,3}]  }
   0x1   :  { %s455_s14 = smov 0  }
   0x2 LB: > { %s25_s15 = sadd.s32 1, %s425_s13  ;;  %p372_p0 = scmp.ge.s32.totalorder %s429_s14, 1  ;;  %s429_s14 = sphi %s455_s14, %s13_s14   ;;  %s425_s13 = sphi %s453_s13, %s516_s13   ;;  %s421_s12 = sphi %s451_s12, %s515_s12  }
   0x3   : > { %p27_p1 = scmp.ge.s32.totalorder %s25_s15, 2  ;;  %p158_p2 = scmp.lt.s32.totalorder %s429_s14, 3 }
   0x5   : > { %s518_s15 = smov (%p27_p1, %s25_s15), 0  ;;  %p159_p3 = pnand %p372_p0, %p158_p2 }
   0x6   : > { %p191_p4 = scmp.lt.s32.totalorder (!%p159_p3), %s421_s12, 1 }
   0x7   : > { %162 = sbr.rel (%p159_p3) target bundleno = 31 (0x1f), region = 32 }
   0xc   : > { %s520_s12 = smov (!%p191_p4, %s421_s12), 1  ;;  %v377_v0 = vld [vmem:[%s512_s1] ss:$0 sm:$0xff]  ;;  %vm272_vm0 = vcmask 64512  }
   0xd   : > { %s381_s16 = sshll.u32 %s520_s12, 6  ;;  %v378_v1 = vld [vmem:[%s513_s2] ss:$0 sm:$0xff] }
   0xe   : > { %s198_s21 = scalar_lea.vmem %s511_s0, %s381_s16  ;;  %s484_s26 = scalar_lea.vmem %s514_s3, %s381_s16 }
   0xf   : > { %v210_v2 = vld [vmem:[%s198_s21] sm:$0xff]  ;;  %v211_v3 = vld [vmem:[%s198_s21 + $0x8] sm:$0xff]  ;;  %v212_v4 = vld [vmem:[%s198_s21 + $0x10] sm:$0xff] }
  0x10   : > { %v213_v5 = vld [vmem:[%s198_s21 + $0x18] sm:$0xff]  ;;  %v214_v6 = vld [vmem:[%s198_s21 + $0x20] sm:$0xff]  ;;  %v215_v7 = vld [vmem:[%s198_s21 + $0x28] sm:$0xff]  ;;  %v225_v8 = vmul.f32 %v377_v0, %v210_v2  ;;  %v226_v9 = vmul.f32 %v377_v0, %v211_v3  ;;  %v227_v10 = vmul.f32 %v377_v0, %v212_v4 }
  0x11   : > { %v216_v11 = vld [vmem:[%s198_s21 + $0x30] sm:$0xff]  ;;  %v217_v12 = vld [vmem:[%s198_s21 + $0x38] sm:$0xff]  ;;  %v228_v13 = vmul.f32 %v377_v0, %v213_v5  ;;  %v229_v14 = vmul.f32 %v377_v0, %v214_v6  ;;  %v230_v15 = vmul.f32 %v377_v0, %v215_v7 }
  0x12   : > { %v240_v16 = vadd.f32 %v378_v1, %v225_v8  ;;  %v241_v17 = vadd.f32 %v378_v1, %v226_v9  ;;  %v242_v18 = vadd.f32 %v378_v1, %v227_v10  ;;  %v231_v19 = vmul.f32 %v377_v0, %v216_v11 }
  0x13   : > { %v243_v20 = vadd.f32 %v378_v1, %v228_v13  ;;  %v244_v21 = vadd.f32 %v378_v1, %v229_v14  ;;  %v245_v22 = vadd.f32 %v378_v1, %v230_v15  ;;  %v232_v23 = vmul.f32 %v377_v0, %v217_v12 }
  0x14   : > { %vm248_vm1 = vcmp.ge.f32.partialorder %v240_v16, 0.0  ;;  %v256_v24 = vmul.f32 0.2, %v240_v16  ;;  %vm249_vm2 = vcmp.ge.f32.partialorder %v241_v17, 0.0  ;;  %v257_v25 = vmul.f32 0.2, %v241_v17 }
  0x15   : > { %vm250_vm3 = vcmp.ge.f32.partialorder %v242_v18, 0.0  ;;  %v258_v26 = vmul.f32 0.2, %v242_v18  ;;  %vm251_vm4 = vcmp.ge.f32.partialorder %v243_v20, 0.0  ;;  %v259_v27 = vmul.f32 0.2, %v243_v20 }
  0x16   : > { %v264_v28 = vsel %vm248_vm1, %v240_v16, %v256_v24  ;;  %v265_v29 = vsel %vm249_vm2, %v241_v17, %v257_v25  ;;  %vm252_vm5 = vcmp.ge.f32.partialorder %v244_v21, 0.0  ;;  %v260_v30 = vmul.f32 0.2, %v244_v21 }
  0x17   : > { %273 = vst.msk [vmem:[%s484_s26] sm:$0xff] %vm272_vm0, %v264_v28  ;;  %274 = vst.msk [vmem:[%s484_s26 + $0x8] sm:$0xff] %vm272_vm0, %v265_v29  ;;  %v266_v31 = vsel %vm250_vm3, %v242_v18, %v258_v26  ;;  %v267_v32 = vsel %vm251_vm4, %v243_v20, %v259_v27  ;;  %vm253_vm6 = vcmp.ge.f32.partialorder %v245_v22, 0.0  ;;  %v261_v33 = vmul.f32 0.2, %v245_v22 }
  0x18   : > { %275 = vst.msk [vmem:[%s484_s26 + $0x10] sm:$0xff] %vm272_vm0, %v266_v31  ;;  %276 = vst.msk [vmem:[%s484_s26 + $0x18] sm:$0xff] %vm272_vm0, %v267_v32  ;;  %v268_v34 = vsel %vm252_vm5, %v244_v21, %v260_v30  ;;  %v246_v35 = vadd.f32 %v378_v1, %v231_v19  ;;  %v247_v36 = vadd.f32 %v378_v1, %v232_v23 }
  0x19   : > { %277 = vst.msk [vmem:[%s484_s26 + $0x20] sm:$0xff] %vm272_vm0, %v268_v34  ;;  %v269_v37 = vsel %vm253_vm6, %v245_v22, %v261_v33 }
  0x1a   : > { %278 = vst.msk [vmem:[%s484_s26 + $0x28] sm:$0xff] %vm272_vm0, %v269_v37  ;;  %vm254_vm7 = vcmp.ge.f32.partialorder %v246_v35, 0.0  ;;  %v262_v38 = vmul.f32 0.2, %v246_v35  ;;  %vm255_vm8 = vcmp.ge.f32.partialorder %v247_v36, 0.0 }
  0x1b   : > { %v263_v39 = vmul.f32 0.2, %v247_v36 }
  0x1c   : > { %v270_v40 = vsel %vm254_vm7, %v246_v35, %v262_v38 }
  0x1d   : > { %v271_v41 = vsel %vm255_vm8, %v247_v36, %v263_v39  ;;  %279 = vst.msk [vmem:[%s484_s26 + $0x30] sm:$0xff] %vm272_vm0, %v270_v40 }
  0x1e   : > { %280 = vst.msk [vmem:[%s484_s26 + $0x38] sm:$0xff] %vm272_vm0, %v271_v41 }
  0x1f PF: > { %s13_s14 = sadd.s32 1, %s429_s14   ;;  %s515_s12 = smov %s425_s13 }
  0x20   : > { %p10_p5 = scmp.ge.s32.totalorder %s13_s14, 4   ;;  %s516_s13 = smov %s518_s15 }
  0x22   :  { %12 = sbr.rel (!%p10_p5) target bundleno = 2 (0x2), region = 62 }

// kernel: downsampler_forward.2
= control target key start
LH: loop header
LB: loop body
LE: loop exit
PB: predicated region body
PF: predicated region fallthrough
CT: control target
= control target key end

     0   :  { %s2595_s15 = smov 0   ;;  %s2597_s16 = smov 0   ;;  %s2881_s0 = inlined_call_operand.vmem [shape: bf16[2,9,9,16], index: 0, kind: input, shape index: {}, may-alias: {0,1}]   ;;  %s2882_s1 = inlined_call_operand.vmem [shape: bf16[2,9,9,16], index: 1, kind: input, shape index: {}, may-alias: {0,1}]   ;;  %s2883_s2 = inlined_call_operand.vmem [shape: bf16[4,16,8], index: 2, kind: input, shape index: {}]   ;;  %s2884_s3 = inlined_call_operand.vmem [shape: f32[2,8,8,8], index: 3, kind: output, shape index: {0}]   ;;  %s2885_s4 = inlined_call_operand.vmem [shape: f32[2,1,2,8], index: 4, kind: output, shape index: {1}]  }
   0x1   :  { %s2599_s17 = smov 0  }
   0x2 LB: > { %s27_s18 = sadd.s32 1, %s2562_s16  ;;  %p2163_p0 = scmp.ge.s32.totalorder %s2566_s17, 1  ;;  %s2566_s17 = sphi %s2599_s17, %s15_s17   ;;  %s2562_s16 = sphi %s2597_s16, %s2887_s16   ;;  %s2558_s15 = sphi %s2595_s15, %s2886_s15  }
   0x3   : > { %p29_p1 = scmp.ge.s32.totalorder %s27_s18, 2  ;;  %p223_p2 = scmp.lt.s32.totalorder %s2566_s17, 3 }
   0x5   : > { %s2889_s18 = smov (%p29_p1, %s27_s18), 0  ;;  %p224_p3 = pnand %p2163_p0, %p223_p2 }
   0x6   : > { %p287_p4 = scmp.lt.s32.totalorder (!%p224_p3), %s2558_s15, 1 }
   0x7   : > { %227 = sbr.rel (%p224_p3) target bundleno = 360 (0x168), region = 32 }
   0xc   : > { %v2616_v0 = vld [vmem:[%s2883_s2] sm:$0xff]   ;;  %v2568_v1 = vmov 0.0   ;;  %v2623_v2 = vld [vmem:[%s2883_s2 + $0x8] sm:$0xff]   ;;  %vm2569_vm0 = vmmov 0   ;;  %s2891_s15 = smov (!%p287_p4, %s2558_s15), 1  ;;  %vm367_vm1 = vcmask 130048  }
   0xd   : > { %2316 = vmatprep.subr.bf16.mxu1 %v2568_v1  ;;  %2310 = vmatprep.subr.bf16.mxu0 %v2568_v1  ;;  %s2502_s23 = smul.u32 72, %s2891_s15  ;;  %v2639_v3 = vld [vmem:[%s2883_s2 + $0x18] sm:$0xff]   ;;  %v2660_v15 = vld [vmem:[%s2883_s2 + $0x10] sm:$0xff]   ;;  %s2245_s9 = sshll.u32 %s2891_s15, 6  ;;  %vm572_vm2 = vcmask 64512   ;;  %vm2004_vm3 = vcmask 57344  }
   0xe   : > { %2317 = vmatpush3.bf16.msra.mxu1 %v2616_v0  ;;  %2318 = vmatprep.mubr.msk.bf16.mxu1 %vm2569_vm0, %v2568_v1  ;;  %s2828_s12 = scalar_lea.vmem %s2884_s3, %s2245_s9  ;;  %s2168_s13 = sshll.u32 %s2891_s15, 1 }
   0xf   : > { %2311 = vmatpush3.bf16.msra.mxu0 %v2623_v2  ;;  %2312 = vmatprep.mubr.msk.bf16.mxu0 %vm2569_vm0, %v2568_v1  ;;  %s2646_s28 = scalar_lea.vmem %s2881_s0, %s2502_s23  ;;  %s2244_s5 = sadd.s32 64, %s2502_s23 }
  0x10   : > { %2322 = vmatprep.subr.bf16.mxu0 %v2568_v1  ;;  %2328 = vmatprep.subr.bf16.mxu1 %v2568_v1  ;;  %v344_v4 = vld [vmem:[%s2646_s28] sm:$0xf]  ;;  %v345_v5 = vld [vmem:[%s2646_s28 + $0x4] sm:$0x1]  ;;  %v2175_v6 = vld [vmem:[%s2646_s28 + $0x8] sm:$0xf]  ;;  %s312_s8 = scalar_lea.vmem %s2882_s1, %s2244_s5  ;;  %s331_s20 = scalar_lea.vmem %s2885_s4, %s2168_s13 }
  0x11   : > { %v2177_v7 = vcombine.low %v344_v4, %v345_v5  ;;  %2319 = vmatmul.mubr.msk.bf16.vlgmr.msra.gmra.mxu1 %vm367_vm1, %v344_v4  ;;  %v2176_v8 = vld [vmem:[%s2646_s28 + $0xc] sm:$0x1]  ;;  %v2187_v18 = vld [vmem:[%s2646_s28 + $0x10] sm:$0xf]  ;;  %v2188_v19 = vld [vmem:[%s2646_s28 + $0x14] sm:$0x1] }
  0x12   : > { %2329 = vmatpush3.bf16.msra.mxu1 %v2639_v3  ;;  %2330 = vmatprep.mubr.msk.bf16.mxu1 %vm2569_vm0, %v2568_v1  ;;  %v2184_v9 = vcombine.low %v2175_v6, %v2176_v8  ;;  %v2192_v21 = vcombine.low %v2187_v18, %v2188_v19  ;;  %v2195_v26 = vld [vmem:[%s2646_s28 + $0x18] sm:$0xf]  ;;  %v2196_v27 = vld [vmem:[%s2646_s28 + $0x1c] sm:$0x1]  ;;  %v2203_v33 = vld [vmem:[%s2646_s28 + $0x20] sm:$0xf] }
  0x13   : > { %v355_v10 = vshrl.u32 %v2177_v7, 16  ;;  %v357_v11 = vshll.u32 %v2177_v7, 16  ;;  %2340 = vmatprep.subr.bf16.mxu1 %v2568_v1  ;;  %v2200_v28 = vcombine.low %v2195_v26, %v2196_v27  ;;  %v2204_v34 = vld [vmem:[%s2646_s28 + $0x24] sm:$0x1]  ;;  %v2211_v40 = vld [vmem:[%s2646_s28 + $0x28] sm:$0xf] }
  0x14   : > { %v516_v12 = vshrl.u32 %v2184_v9, 16  ;;  %v518_v13 = vshll.u32 %v2184_v9, 16  ;;  %v726_v22 = vshll.u32 %v2192_v21, 16  ;;  %v724_v23 = vshrl.u32 %v2192_v21, 16  ;;  %v2212_v41 = vld [vmem:[%s2646_s28 + $0x2c] sm:$0x1] }
  0x15   : > { %v359_v14 = vrot.slane %v357_v11, 1  ;;  %v928_v29 = vshll.u32 %v2200_v28, 16  ;;  %v926_v30 = vshrl.u32 %v2200_v28, 16  ;;  %v2208_v35 = vcombine.low %v2203_v33, %v2204_v34  ;;  %v2219_v47 = vld [vmem:[%s2646_s28 + $0x30] sm:$0xf] }
  0x16   : > { %v520_v16 = vrot.slane %v518_v13, 1  ;;  %v728_v24 = vrot.slane %v726_v22, 1  ;;  %v2216_v42 = vcombine.low %v2211_v40, %v2212_v41  ;;  %v2220_v48 = vld [vmem:[%s2646_s28 + $0x34] sm:$0x1]  ;;  %v2227_v54 = vld [vmem:[%s2646_s28 + $0x38] sm:$0xf] }
  0x17   : > { %v360_v17 = vor.u32 %v359_v14, %v355_v10  ;;  %v930_v31 = vrot.slane %v928_v29, 1  ;;  %v1130_v36 = vshll.u32 %v2208_v35, 16  ;;  %v1128_v37 = vshrl.u32 %v2208_v35, 16  ;;  %v2228_v55 = vld [vmem:[%s2646_s28 + $0x3c] sm:$0x1] }
  0x18   : > { %v521_v20 = vor.u32 %v520_v16, %v516_v12  ;;  %v729_v25 = vor.u32 %v728_v24, %v724_v23  ;;  %v1332_v43 = vshll.u32 %v2216_v42, 16  ;;  %v1330_v44 = vshrl.u32 %v2216_v42, 16  ;;  %v1803_v61 = vld [vmem:[%s312_s8] sm:$0xf]  ;;  %v1804_v62 = vld [vmem:[%s312_s8 + $0x4] sm:$0x1] }
  0x19   : > { %2313 = vmatmul.mubr.msk.bf16.vlgmr.msra.gmra.mxu0 %vm367_vm1, %v360_v17  ;;  %v931_v32 = vor.u32 %v930_v31, %v926_v30  ;;  %v1132_v38 = vrot.slane %v1130_v36, 1  ;;  %v2224_v49 = vcombine.low %v2219_v47, %v2220_v48  ;;  %v2232_v56 = vcombine.low %v2227_v54, %v2228_v55 }
  0x1a   : > { %2323 = vmatpush3.bf16.msra.mxu0 %v2660_v15  ;;  %2331 = vmatmul.mubr.msk.bf16.vlgmr.msra.gmra.mxu1 %vm367_vm1, %v521_v20  ;;  %v1334_v45 = vrot.slane %v1332_v43, 1  ;;  %v2238_v63 = vcombine.low %v1803_v61, %v1804_v62 }
  0x1b   : > { %2324 = vmatprep.mubr.msk.bf16.mxu0 %vm2569_vm0, %v2568_v1  ;;  %2334 = vmatprep.subr.bf16.mxu0 %v2568_v1  ;;  %v1133_v39 = vor.u32 %v1132_v38, %v1128_v37  ;;  %v1534_v50 = vshll.u32 %v2224_v49, 16  ;;  %v1532_v51 = vshrl.u32 %v2224_v49, 16  ;;  %v1736_v57 = vshll.u32 %v2232_v56, 16 }
  0x1c   : > { %2341 = vmatpush3.bf16.msra.mxu1 %v2616_v0  ;;  %2342 = vmatprep.mubr.msk.bf16.mxu1 %vm2569_vm0, %v2568_v1  ;;  %v1335_v46 = vor.u32 %v1334_v45, %v1330_v44  ;;  %v1734_v58 = vshrl.u32 %v2232_v56, 16  ;;  %v1937_v4 = vshll.u32 %v2238_v63, 16  ;;  %v1935_v5 = vshrl.u32 %v2238_v63, 16 }
  0x1d   : > { %2352 = vmatprep.subr.bf16.mxu1 %v2568_v1  ;;  %v1536_v52 = vrot.slane %v1534_v50, 1  ;;  %v1738_v59 = vrot.slane %v1736_v57, 1 }
  0x1f   : > { %v1537_v53 = vor.u32 %v1536_v52, %v1532_v51  ;;  %v1739_v60 = vor.u32 %v1738_v59, %v1734_v58 }
  0x21   : > { %2325 = vmatmul.mubr.msk.bf16.vlgmr.msra.gmra.mxu0 %vm367_vm1, %v2175_v6 }
  0x22   : > { %2335 = vmatpush3.bf16.msra.mxu0 %v2623_v2  ;;  %2343 = vmatmul.mubr.msk.bf16.vlgmr.msra.gmra.mxu1 %vm367_vm1, %v2175_v6  ;;  %v1939_v6 = vrot.slane %v1937_v4, 1 }
  0x23   : > { %2336 = vmatprep.mubr.msk.bf16.mxu0 %vm2569_vm0, %v2568_v1  ;;  %2346 = vmatprep.subr.bf16.mxu0 %v2568_v1 }
  0x24   : > { %2353 = vmatpush3.bf16.msra.mxu1 %v2639_v3  ;;  %2354 = vmatprep.mubr.msk.bf16.mxu1 %vm2569_vm0, %v2568_v1 }
  0x25   : > { %2364 = vmatprep.subr.bf16.mxu1 %v2568_v1 }
  0x29   : > { %2337 = vmatmul.mubr.msk.bf16.vlgmr.msra.gmra.mxu0 %vm367_vm1, %v521_v20 }
  0x2a   : > { %2347 = vmatpush3.bf16.msra.mxu0 %v2660_v15  ;;  %2355 = vmatmul.mubr.msk.bf16.vlgmr.msra.gmra.mxu1 %vm367_vm1, %v729_v25 }
  0x2b   : > { %2348 = vmatprep.mubr.msk.bf16.mxu0 %vm2569_vm0, %v2568_v1  ;;  %2358 = vmatprep.subr.bf16.mxu0 %v2568_v1 }
  0x2c   : > { %2365 = vmatpush3.bf16.msra.mxu1 %v2616_v0  ;;  %2366 = vmatprep.mubr.msk.bf16.mxu1 %vm2569_vm0, %v2568_v1 }
  0x2d   : > { %2376 = vmatprep.subr.bf16.mxu1 %v2568_v1 }
  0x31   : > { %2349 = vmatmul.mubr.msk.bf16.vlgmr.msra.gmra.mxu0 %vm367_vm1, %v2187_v18 }
  0x32   : > { %2359 = vmatpush3.bf16.msra.mxu0 %v2623_v2  ;;  %2367 = vmatmul.mubr.msk.bf16.vlgmr.msra.gmra.mxu1 %vm367_vm1, %v2187_v18 }
  0x33   : > { %2360 = vmatprep.mubr.msk.bf16.mxu0 %vm2569_vm0, %v2568_v1  ;;  %2370 = vmatprep.subr.bf16.mxu0 %v2568_v1 }
  0x34   : > { %2377 = vmatpush3.bf16.msra.mxu1 %v2639_v3  ;;  %2378 = vmatprep.mubr.msk.bf16.mxu1 %vm2569_vm0, %v2568_v1 }
  0x35   : > { %2388 = vmatprep.subr.bf16.mxu1 %v2568_v1 }
  0x39   : > { %2361 = vmatmul.mubr.msk.bf16.vlgmr.msra.gmra.mxu0 %vm367_vm1, %v729_v25 }
  0x3a   : > { %2371 = vmatpush3.bf16.msra.mxu0 %v2660_v15  ;;  %2379 = vmatmul.mubr.msk.bf16.vlgmr.msra.gmra.mxu1 %vm367_vm1, %v931_v32 }
  0x3b   : > { %2372 = vmatprep.mubr.msk.bf16.mxu0 %vm2569_vm0, %v2568_v1  ;;  %2382 = vmatprep.subr.bf16.mxu0 %v2568_v1 }
  0x3c   : > { %2389 = vmatpush3.bf16.msra.mxu1 %v2616_v0  ;;  %2390 = vmatprep.mubr.msk.bf16.mxu1 %vm2569_vm0, %v2568_v1 }
  0x3d   : > { %2400 = vmatprep.subr.bf16.mxu1 %v2568_v1 }
  0x41   : > { %2373 = vmatmul.mubr.msk.bf16.vlgmr.msra.gmra.mxu0 %vm367_vm1, %v2195_v26 }
  0x42   : > { %2383 = vmatpush3.bf16.msra.mxu0 %v2623_v2  ;;  %2391 = vmatmul.mubr.msk.bf16.vlgmr.msra.gmra.mxu1 %vm367_vm1, %v2195_v26 }
  0x43   : > { %2384 = vmatprep.mubr.msk.bf16.mxu0 %vm2569_vm0, %v2568_v1  ;;  %2394 = vmatprep.subr.bf16.mxu0 %v2568_v1 }
  0x44   : > { %2401 = vmatpush3.bf16.msra.mxu1 %v2639_v3  ;;  %2402 = vmatprep.mubr.msk.bf16.mxu1 %vm2569_vm0, %v2568_v1 }
  0x45   : > { %2412 = vmatprep.subr.bf16.mxu1 %v2568_v1 }
  0x49   : > { %2385 = vmatmul.mubr.msk.bf16.vlgmr.msra.gmra.mxu0 %vm367_vm1, %v931_v32 }
  0x4a   : > { %2395 = vmatpush3.bf16.msra.mxu0 %v2660_v15  ;;  %2403 = vmatmul.mubr.msk.bf16.vlgmr.msra.gmra.mxu1 %vm367_vm1, %v1133_v39 }
  0x4b   : > { %2396 = vmatprep.mubr.msk.bf16.mxu0 %vm2569_vm0, %v2568_v1  ;;  %2406 = vmatprep.subr.bf16.mxu0 %v2568_v1 }
  0x4c   : > { %2413 = vmatpush3.bf16.msra.mxu1 %v2616_v0  ;;  %2414 = vmatprep.mubr.msk.bf16.mxu1 %vm2569_vm0, %v2568_v1 }
  0x4d   : > { %2424 = vmatprep.subr.bf16.mxu1 %v2568_v1 }
  0x51   : > { %2397 = vmatmul.mubr.msk.bf16.vlgmr.msra.gmra.mxu0 %vm367_vm1, %v2203_v33 }
  0x52   : > { %2407 = vmatpush3.bf16.msra.mxu0 %v2623_v2  ;;  %2415 = vmatmul.mubr.msk.bf16.vlgmr.msra.gmra.mxu1 %vm367_vm1, %v2203_v33 }
  0x53   : > { %2408 = vmatprep.mubr.msk.bf16.mxu0 %vm2569_vm0, %v2568_v1  ;;  %2418 = vmatprep.subr.bf16.mxu0 %v2568_v1 }
  0x54   : > { %2425 = vmatpush3.bf16.msra.mxu1 %v2639_v3  ;;  %2426 = vmatprep.mubr.msk.bf16.mxu1 %vm2569_vm0, %v2568_v1 }
  0x55   : > { %2436 = vmatprep.subr.bf16.mxu1 %v2568_v1 }
  0x59   : > { %2409 = vmatmul.mubr.msk.bf16.vlgmr.msra.gmra.mxu0 %vm367_vm1, %v1133_v39 }
  0x5a   : > { %2419 = vmatpush3.bf16.msra.mxu0 %v2660_v15  ;;  %2427 = vmatmul.mubr.msk.bf16.vlgmr.msra.gmra.mxu1 %vm367_vm1, %v1335_v46 }
  0x5b   : > { %2420 = vmatprep.mubr.msk.bf16.mxu0 %vm2569_vm0, %v2568_v1  ;;  %2430 = vmatprep.subr.bf16.mxu0 %v2568_v1 }
  0x5c   : > { %2437 = vmatpush3.bf16.msra.mxu1 %v2616_v0  ;;  %2438 = vmatprep.mubr.msk.bf16.mxu1 %vm2569_vm0, %v2568_v1 }
  0x5d   : > { %2448 = vmatprep.subr.bf16.mxu1 %v2568_v1 }
  0x61   : > { %2421 = vmatmul.mubr.msk.bf16.vlgmr.msra.gmra.mxu0 %vm367_vm1, %v2211_v40 }
  0x62   : > { %2431 = vmatpush3.bf16.msra.mxu0 %v2623_v2  ;;  %2439 = vmatmul.mubr.msk.bf16.vlgmr.msra.gmra.mxu1 %vm367_vm1, %v2211_v40 }
  0x63   : > { %2432 = vmatprep.mubr.msk.bf16.mxu0 %vm2569_vm0, %v2568_v1  ;;  %2442 = vmatprep.subr.bf16.mxu0 %v2568_v1 }
  0x64   : > { %2449 = vmatpush3.bf16.msra.mxu1 %v2639_v3  ;;  %2450 = vmatprep.mubr.msk.bf16.mxu1 %vm2569_vm0, %v2568_v1 }
  0x65   : > { %2460 = vmatprep.subr.bf16.mxu1 %v2568_v1 }
  0x69   : > { %2433 = vmatmul.mubr.msk.bf16.vlgmr.msra.gmra.mxu0 %vm367_vm1, %v1335_v46 }
  0x6a   : > { %2443 = vmatpush3.bf16.msra.mxu0 %v2660_v15  ;;  %2451 = vmatmul.mubr.msk.bf16.vlgmr.msra.gmra.mxu1 %vm367_vm1, %v1537_v53 }
  0x6b   : > { %2444 = vmatprep.mubr.msk.bf16.mxu0 %vm2569_vm0, %v2568_v1  ;;  %2454 = vmatprep.subr.bf16.mxu0 %v2568_v1 }
  0x6c   : > { %2461 = vmatpush3.bf16.msra.mxu1 %v2616_v0  ;;  %2462 = vmatprep.mubr.msk.bf16.mxu1 %vm2569_vm0, %v2568_v1 }
  0x6d   : > { %2472 = vmatprep.subr.bf16.mxu1 %v2568_v1 }
  0x71   : > { %2445 = vmatmul.mubr.msk.bf16.vlgmr.msra.gmra.mxu0 %vm367_vm1, %v2219_v47 }
  0x72   : > { %2455 = vmatpush3.bf16.msra.mxu0 %v2623_v2  ;;  %2463 = vmatmul.mubr.msk.bf16.vlgmr.msra.gmra.mxu1 %vm367_vm1, %v2219_v47 }
  0x73   : > { %2456 = vmatprep.mubr.msk.bf16.mxu0 %vm2569_vm0, %v2568_v1  ;;  %2466 = vmatprep.subr.bf16.mxu0 %v2568_v1 }
  0x74   : > { %2473 = vmatpush3.bf16.msra.mxu1 %v2639_v3  ;;  %2474 = vmatprep.mubr.msk.bf16.mxu1 %vm2569_vm0, %v2568_v1 }
  0x75   : > { %2484 = vmatprep.subr.bf16.mxu1 %v2568_v1 }
  0x79   : > { %2457 = vmatmul.mubr.msk.bf16.vlgmr.msra.gmra.mxu0 %vm367_vm1, %v1537_v53 }
  0x7a   : > { %2467 = vmatpush3.bf16.msra.mxu0 %v2660_v15  ;;  %2475 = vmatmul.mubr.msk.bf16.vlgmr.msra.gmra.mxu1 %vm367_vm1, %v1739_v60 }
  0x7b   : > { %2468 = vmatprep.mubr.msk.bf16.mxu0 %vm2569_vm0, %v2568_v1  ;;  %2478 = vmatprep.subr.bf16.mxu0 %v2568_v1 }
  0x7c   : > { %2485 = vmatpush3.bf16.msra.mxu1 %v2616_v0  ;;  %2486 = vmatprep.mubr.msk.bf16.mxu1 %vm2569_vm0, %v2568_v1  ;;  %v1940_v0 = vor.u32 %v1939_v6, %v1935_v5 }
  0x7d   : > { %2496 = vmatprep.subr.bf16.mxu1 %v2568_v1 }
  0x81   : > { %2469 = vmatmul.mubr.msk.bf16.vlgmr.msra.gmra.mxu0 %vm367_vm1, %v2227_v54 }
  0x82   : > { %2479 = vmatpush3.bf16.msra.mxu0 %v2623_v2  ;;  %2487 = vmatmul.mubr.msk.bf16.vlgmr.msra.gmra.mxu1 %vm367_vm1, %v2227_v54 }
  0x83   : > { %2480 = vmatprep.mubr.msk.bf16.mxu0 %vm2569_vm0, %v2568_v1  ;;  %2490 = vmatprep.subr.bf16.mxu0 %v2568_v1 }
  0x84   : > { %2497 = vmatpush3.bf16.msra.mxu1 %v2639_v3  ;;  %2498 = vmatprep.mubr.msk.bf16.mxu1 %vm2569_vm0, %v2568_v1 }
  0x89   : > { %2481 = vmatmul.mubr.msk.bf16.vlgmr.msra.gmra.mxu0 %vm367_vm1, %v1739_v60 }
  0x8a   : > { %2491 = vmatpush3.bf16.msra.mxu0 %v2660_v15  ;;  %2499 = vmatmul.mubr.msk.bf16.vlgmr.msra.gmra.mxu1 %vm367_vm1, %v1940_v0 }
  0x8b   : > { %2492 = vmatprep.mubr.msk.bf16.mxu0 %vm2569_vm0, %v2568_v1 }
  0x91   : > { %2493 = vmatmul.mubr.msk.bf16.vlgmr.msra.gmra.mxu0 %vm367_vm1, %v1803_v61 }
  0xd1   : > { %v454_v2 = vpop.f32.mrf.mxu1 }
  0xd3   : > { %v2320_v7 = vpop.f32.mrf.mxu1 }
  0xd5   : > { %v457_v8 = vpop.f32.mrf.mxu1 }
  0xd7   : > { %v2321_v3 = vpop.f32.mrf.mxu1 }
  0xd9   : > { %v405_v9 = vpop.f32.mrf.mxu0 }
  0xda   : > { %v565_v10 = vpop.f32.mrf.mxu1  ;;  %v455_v15 = vadd.f32 %v454_v2, %v405_v9 }
  0xdb   : > { %v2314_v11 = vpop.f32.mrf.mxu0 }
  0xdc   : > { %v2332_v12 = vpop.f32.mrf.mxu1 }
  0xdd   : > { %v408_v13 = vpop.f32.mrf.mxu0 }
  0xde   : > { %v568_v14 = vpop.f32.mrf.mxu1 }
  0xdf   : > { %v2315_v16 = vpop.f32.mrf.mxu0 }
  0xe0   : > { %v2333_v17 = vpop.f32.mrf.mxu1 }
  0xe1   : > { %v503_v18 = vpop.f32.mrf.mxu0 }
  0xe2   : > { %v509_v19 = vadd.f32 %v503_v18, %v455_v15  ;;  %v668_v20 = vpop.f32.mrf.mxu1 }
  0xe3   : > { %v2326_v1 = vpop.f32.mrf.mxu0 }
  0xe4   : > { %v571_v21 = vadd.f32 %v565_v10, %v509_v19  ;;  %v2344_v22 = vpop.f32.mrf.mxu1 }
  0xe5   : > { %v506_v23 = vpop.f32.mrf.mxu0 }
  0xe6   : > { %573 = vst.msk [vmem:[%s2828_s12] sm:$0xff] %vm572_vm2, %v571_v21  ;;  %v671_v24 = vpop.f32.mrf.mxu1  ;;  %v582_v26 = vmul.f32 %v571_v21, %v571_v21  ;;  %v574_v29 = vsel %vm572_vm2, %v571_v21, 0.0 }
  0xe7   : > { %v2327_v25 = vpop.f32.mrf.mxu0  ;;  %v575_v34 = vrot.slane %v574_v29, 4 }
  0xe8   : > { %v2345_v27 = vpop.f32.mrf.mxu1  ;;  %v583_v32 = vsel %vm572_vm2, %v582_v26, 0.0 }
  0xe9   : > { %v628_v28 = vpop.f32.mrf.mxu0  ;;  %v584_v37 = vrot.slane %v583_v32, 4  ;;  %v576_v41 = vadd.f32 %v575_v34, %v574_v29 }
  0xea   : > { %v767_v30 = vpop.f32.mrf.mxu1  ;;  %v669_v39 = vadd.f32 %v668_v20, %v628_v28 }
  0xeb   : > { %v2338_v31 = vpop.f32.mrf.mxu0  ;;  %v585_v45 = vadd.f32 %v584_v37, %v583_v32  ;;  %v577_v49 = vrot.slane %v576_v41, 2 }
  0xec   : > { %v2356_v33 = vpop.f32.mrf.mxu1 }
  0xed   : > { %v631_v35 = vpop.f32.mrf.mxu0  ;;  %v586_v54 = vrot.slane %v585_v45, 2  ;;  %v578_v59 = vadd.f32 %v577_v49, %v576_v41 }
  0xee   : > { %v770_v36 = vpop.f32.mrf.mxu1 }
  0xef   : > { %v2339_v38 = vpop.f32.mrf.mxu0  ;;  %v587_v4 = vadd.f32 %v586_v54, %v585_v45  ;;  %v579_v7 = vrot.slane %v578_v59, 1 }
  0xf0   : > { %v2357_v40 = vpop.f32.mrf.mxu1 }
  0xf1   : > { %v711_v42 = vpop.f32.mrf.mxu0  ;;  %v588_v11 = vrot.slane %v587_v4, 1  ;;  %v580_v17 = vadd.f32 %v579_v7, %v578_v59 }
  0xf2   : > { %v717_v43 = vadd.f32 %v711_v42, %v669_v39  ;;  %v870_v44 = vpop.f32.mrf.mxu1 }
  0xf3   : > { %v2350_v46 = vpop.f32.mrf.mxu0  ;;  %v589_v22 = vadd.f32 %v588_v11, %v587_v4 }
  0xf4   : > { %v773_v47 = vadd.f32 %v767_v30, %v717_v43  ;;  %v2368_v48 = vpop.f32.mrf.mxu1 }
  0xf5   : > { %v714_v50 = vpop.f32.mrf.mxu0 }
  0xf6   : > { %2194 = vst.msk [vmem:[%s2828_s12 + $0x8] sm:$0xff] %vm572_vm2, %v773_v47  ;;  %v776_v51 = vsel %vm572_vm2, %v773_v47, 0.0  ;;  %v784_v52 = vmul.f32 %v773_v47, %v773_v47  ;;  %v873_v53 = vpop.f32.mrf.mxu1 }
  0xf7   : > { %v777_v55 = vrot.slane %v776_v51, 4  ;;  %v2351_v56 = vpop.f32.mrf.mxu0 }
  0xf8   : > { %v785_v57 = vsel %vm572_vm2, %v784_v52, 0.0  ;;  %v2369_v58 = vpop.f32.mrf.mxu1 }
  0xf9   : > { %v778_v60 = vadd.f32 %v777_v55, %v776_v51  ;;  %v786_v61 = vrot.slane %v785_v57, 4  ;;  %v830_v62 = vpop.f32.mrf.mxu0 }
  0xfa   : > { %v969_v63 = vpop.f32.mrf.mxu1  ;;  %v871_v16 = vadd.f32 %v870_v44, %v830_v62 }
  0xfb   : > { %v779_v5 = vrot.slane %v778_v60, 2  ;;  %v787_v6 = vadd.f32 %v786_v61, %v785_v57  ;;  %v2362_v0 = vpop.f32.mrf.mxu0 }
  0xfc   : > { %v2380_v2 = vpop.f32.mrf.mxu1 }
  0xfd   : > { %v780_v8 = vadd.f32 %v779_v5, %v778_v60  ;;  %v788_v3 = vrot.slane %v787_v6, 2  ;;  %v833_v9 = vpop.f32.mrf.mxu0 }
  0xfe   : > { %v972_v10 = vpop.f32.mrf.mxu1 }
  0xff   : > { %v781_v12 = vrot.slane %v780_v8, 1  ;;  %v789_v13 = vadd.f32 %v788_v3, %v787_v6  ;;  %v2363_v14 = vpop.f32.mrf.mxu0 }
 0x100   : > { %v2381_v15 = vpop.f32.mrf.mxu1 }
 0x101   : > { %v782_v18 = vadd.f32 %v781_v12, %v780_v8  ;;  %v790_v19 = vrot.slane %v789_v13, 1  ;;  %v913_v20 = vpop.f32.mrf.mxu0 }
 0x102   : > { %v919_v1 = vadd.f32 %v913_v20, %v871_v16  ;;  %v1072_v21 = vpop.f32.mrf.mxu1 }
 0x103   : > { %v783_v23 = vadd.f32 %v782_v18, %v580_v17  ;;  %v791_v24 = vadd.f32 %v790_v19, %v789_v13  ;;  %v2374_v25 = vpop.f32.mrf.mxu0 }
 0x104   : > { %v975_v26 = vadd.f32 %v969_v63, %v919_v1  ;;  %v2392_v27 = vpop.f32.mrf.mxu1 }
 0x105   : > { %v792_v28 = vadd.f32 %v791_v24, %v589_v22  ;;  %v916_v29 = vpop.f32.mrf.mxu0 }
 0x106   : > { %2202 = vst.msk [vmem:[%s2828_s12 + $0x10] sm:$0xff] %vm572_vm2, %v975_v26  ;;  %v978_v30 = vsel %vm572_vm2, %v975_v26, 0.0  ;;  %v986_v31 = vmul.f32 %v975_v26, %v975_v26  ;;  %v1075_v32 = vpop.f32.mrf.mxu1 }
 0x107   : > { %v979_v33 = vrot.slane %v978_v30, 4  ;;  %v2375_v34 = vpop.f32.mrf.mxu0 }
 0x108   : > { %v987_v35 = vsel %vm572_vm2, %v986_v31, 0.0  ;;  %v2393_v36 = vpop.f32.mrf.mxu1 }
 0x109   : > { %v980_v37 = vadd.f32 %v979_v33, %v978_v30  ;;  %v988_v38 = vrot.slane %v987_v35, 4  ;;  %v1032_v39 = vpop.f32.mrf.mxu0 }
 0x10a   : > { %v1171_v40 = vpop.f32.mrf.mxu1  ;;  %v1073_v52 = vadd.f32 %v1072_v21, %v1032_v39 }
 0x10b   : > { %v981_v41 = vrot.slane %v980_v37, 2  ;;  %v989_v42 = vadd.f32 %v988_v38, %v987_v35  ;;  %v2386_v43 = vpop.f32.mrf.mxu0 }
 0x10c   : > { %v2404_v44 = vpop.f32.mrf.mxu1 }
 0x10d   : > { %v982_v45 = vadd.f32 %v981_v41, %v980_v37  ;;  %v990_v46 = vrot.slane %v989_v42, 2  ;;  %v1035_v47 = vpop.f32.mrf.mxu0 }
 0x10e   : > { %v1174_v48 = vpop.f32.mrf.mxu1 }
 0x10f   : > { %v983_v49 = vrot.slane %v982_v45, 1  ;;  %v991_v50 = vadd.f32 %v990_v46, %v989_v42  ;;  %v2387_v51 = vpop.f32.mrf.mxu0 }
 0x110   : > { %v2405_v53 = vpop.f32.mrf.mxu1 }
 0x111   : > { %v984_v54 = vadd.f32 %v983_v49, %v982_v45  ;;  %v992_v55 = vrot.slane %v991_v50, 1  ;;  %v1115_v56 = vpop.f32.mrf.mxu0 }
 0x112   : > { %v1121_v57 = vadd.f32 %v1115_v56, %v1073_v52  ;;  %v1274_v58 = vpop.f32.mrf.mxu1 }
 0x113   : > { %v2842_v59 = vadd.f32 %v984_v54, %v783_v23  ;;  %v993_v60 = vadd.f32 %v992_v55, %v991_v50  ;;  %v2398_v61 = vpop.f32.mrf.mxu0 }
 0x114   : > { %v1177_v62 = vadd.f32 %v1171_v40, %v1121_v57  ;;  %v2416_v63 = vpop.f32.mrf.mxu1 }
 0x115   : > { %v2844_v4 = vadd.f32 %v993_v60, %v792_v28  ;;  %v1118_v5 = vpop.f32.mrf.mxu0 }
 0x116   : > { %2210 = vst.msk [vmem:[%s2828_s12 + $0x18] sm:$0xff] %vm572_vm2, %v1177_v62  ;;  %v1277_v6 = vpop.f32.mrf.mxu1  ;;  %v1188_v47 = vmul.f32 %v1177_v62, %v1177_v62  ;;  %v1180_v49 = vsel %vm572_vm2, %v1177_v62, 0.0 }
 0x117   : > { %v2399_v0 = vpop.f32.mrf.mxu0  ;;  %v1181_v55 = vrot.slane %v1180_v49, 4 }
 0x118   : > { %v2417_v2 = vpop.f32.mrf.mxu1  ;;  %v1189_v56 = vsel %vm572_vm2, %v1188_v47, 0.0 }
 0x119   : > { %v1234_v7 = vpop.f32.mrf.mxu0  ;;  %v1190_v0 = vrot.slane %v1189_v56, 4 }
 0x11a   : > { %v1373_v8 = vpop.f32.mrf.mxu1  ;;  %v1275_v13 = vadd.f32 %v1274_v58, %v1234_v7 }
 0x11b   : > { %v2410_v3 = vpop.f32.mrf.mxu0 }
 0x11c   : > { %v2428_v9 = vpop.f32.mrf.mxu1  ;;  %v1182_v3 = vadd.f32 %v1181_v55, %v1180_v49 }
 0x11d   : > { %v1237_v10 = vpop.f32.mrf.mxu0 }
 0x11e   : > { %v1376_v11 = vpop.f32.mrf.mxu1 }
 0x11f   : > { %v2411_v12 = vpop.f32.mrf.mxu0 }
 0x120   : > { %v2429_v14 = vpop.f32.mrf.mxu1 }
 0x121   : > { %v1317_v16 = vpop.f32.mrf.mxu0 }
 0x122   : > { %v1323_v15 = vadd.f32 %v1317_v16, %v1275_v13  ;;  %v1476_v17 = vpop.f32.mrf.mxu1 }
 0x123   : > { %v2422_v18 = vpop.f32.mrf.mxu0 }
 0x124   : > { %v1379_v19 = vadd.f32 %v1373_v8, %v1323_v15  ;;  %v2440_v20 = vpop.f32.mrf.mxu1 }
 0x125   : > { %v1320_v1 = vpop.f32.mrf.mxu0 }
 0x126   : > { %2218 = vst.msk [vmem:[%s2828_s12 + $0x20] sm:$0xff] %vm572_vm2, %v1379_v19  ;;  %v1479_v21 = vpop.f32.mrf.mxu1  ;;  %v1390_v51 = vmul.f32 %v1379_v19, %v1379_v19  ;;  %v1382_v57 = vsel %vm572_vm2, %v1379_v19, 0.0 }
 0x127   : > { %v2423_v22 = vpop.f32.mrf.mxu0  ;;  %v1383_v62 = vrot.slane %v1382_v57, 4 }
 0x128   : > { %v2441_v23 = vpop.f32.mrf.mxu1  ;;  %v1391_v5 = vsel %vm572_vm2, %v1390_v51, 0.0 }
 0x129   : > { %v1436_v24 = vpop.f32.mrf.mxu0  ;;  %v1392_v10 = vrot.slane %v1391_v5, 4  ;;  %v1384_v18 = vadd.f32 %v1383_v62, %v1382_v57  ;;  %v1183_v23 = vrot.slane %v1182_v3, 2 }
 0x12a   : > { %v1575_v25 = vpop.f32.mrf.mxu1  ;;  %v1477_v31 = vadd.f32 %v1476_v17, %v1436_v24  ;;  %v1191_v17 = vadd.f32 %v1190_v0, %v1189_v56 }
 0x12b   : > { %v2434_v26 = vpop.f32.mrf.mxu0  ;;  %v1393_v24 = vadd.f32 %v1392_v10, %v1391_v5 }
 0x12c   : > { %v2452_v27 = vpop.f32.mrf.mxu1 }
 0x12d   : > { %v1439_v28 = vpop.f32.mrf.mxu0 }
 0x12e   : > { %v1578_v29 = vpop.f32.mrf.mxu1 }
 0x12f   : > { %v2435_v30 = vpop.f32.mrf.mxu0  ;;  %v1192_v29 = vrot.slane %v1191_v17, 2 }
 0x130   : > { %v2453_v32 = vpop.f32.mrf.mxu1  ;;  %v1385_v30 = vrot.slane %v1384_v18, 2 }
 0x131   : > { %v1519_v33 = vpop.f32.mrf.mxu0 }
 0x132   : > { %v1525_v34 = vadd.f32 %v1519_v33, %v1477_v31  ;;  %v1678_v35 = vpop.f32.mrf.mxu1 }
 0x133   : > { %v2446_v36 = vpop.f32.mrf.mxu0 }
 0x134   : > { %v1581_v37 = vadd.f32 %v1575_v25, %v1525_v34  ;;  %v2464_v38 = vpop.f32.mrf.mxu1  ;;  %v1394_v36 = vrot.slane %v1393_v24, 2 }
 0x135   : > { %v1522_v39 = vpop.f32.mrf.mxu0 }
 0x136   : > { %2226 = vst.msk [vmem:[%s2828_s12 + $0x28] sm:$0xff] %vm572_vm2, %v1581_v37  ;;  %v1681_v40 = vpop.f32.mrf.mxu1  ;;  %v1592_v60 = vmul.f32 %v1581_v37, %v1581_v37  ;;  %v1584_v2 = vsel %vm572_vm2, %v1581_v37, 0.0  ;;  %v1395_v49 = vadd.f32 %v1394_v36, %v1393_v24 }
 0x137   : > { %v2447_v41 = vpop.f32.mrf.mxu0  ;;  %v1585_v16 = vrot.slane %v1584_v2, 4 }
 0x138   : > { %v2465_v42 = vpop.f32.mrf.mxu1  ;;  %v1593_v11 = vsel %vm572_vm2, %v1592_v60, 0.0  ;;  %v1193_v41 = vadd.f32 %v1192_v29, %v1191_v17  ;;  %v1396_v5 = vrot.slane %v1395_v49, 1 }
 0x139   : > { %v1638_v43 = vpop.f32.mrf.mxu0  ;;  %v1594_v1 = vrot.slane %v1593_v11, 4  ;;  %v1586_v26 = vadd.f32 %v1585_v16, %v1584_v2  ;;  %v1386_v42 = vadd.f32 %v1385_v30, %v1384_v18 }
 0x13a   : > { %v1777_v44 = vpop.f32.mrf.mxu1  ;;  %v1679_v53 = vadd.f32 %v1678_v35, %v1638_v43  ;;  %v1184_v35 = vadd.f32 %v1183_v23, %v1182_v3  ;;  %v1397_v16 = vadd.f32 %v1396_v5, %v1395_v49 }
 0x13b   : > { %v2458_v45 = vpop.f32.mrf.mxu0  ;;  %v1595_v32 = vadd.f32 %v1594_v1, %v1593_v11  ;;  %v1587_v38 = vrot.slane %v1586_v26, 2  ;;  %v1387_v55 = vrot.slane %v1386_v42, 1 }
 0x13c   : > { %v2476_v46 = vpop.f32.mrf.mxu1 }
 0x13d   : > { %v1641_v48 = vpop.f32.mrf.mxu0  ;;  %v1596_v45 = vrot.slane %v1595_v32, 2  ;;  %v1588_v51 = vadd.f32 %v1587_v38, %v1586_v26  ;;  %v1388_v3 = vadd.f32 %v1387_v55, %v1386_v42 }
 0x13e   : > { %v1780_v50 = vpop.f32.mrf.mxu1  ;;  %v1185_v48 = vrot.slane %v1184_v35, 1 }
 0x13f   : > { %v2459_v52 = vpop.f32.mrf.mxu0  ;;  %v1597_v57 = vadd.f32 %v1596_v45, %v1595_v32  ;;  %v1589_v0 = vrot.slane %v1588_v51, 1 }
 0x140   : > { %v2477_v54 = vpop.f32.mrf.mxu1 }
 0x141   : > { %v1721_v58 = vpop.f32.mrf.mxu0  ;;  %v1194_v54 = vrot.slane %v1193_v41, 1  ;;  %v1598_v10 = vrot.slane %v1597_v57, 1 }
 0x142   : > { %v1727_v61 = vadd.f32 %v1721_v58, %v1679_v53  ;;  %v1879_v63 = vpop.f32.mrf.mxu1 }
 0x143   : > { %v2470_v6 = vpop.f32.mrf.mxu0 }
 0x144   : > { %v1783_v7 = vadd.f32 %v1777_v44, %v1727_v61  ;;  %v2488_v8 = vpop.f32.mrf.mxu1  ;;  %v1186_v61 = vadd.f32 %v1185_v48, %v1184_v35 }
 0x145   : > { %v1724_v9 = vpop.f32.mrf.mxu0  ;;  %v1195_v8 = vadd.f32 %v1194_v54, %v1193_v41 }
 0x146   : > { %2234 = vst.msk [vmem:[%s2828_s12 + $0x30] sm:$0xff] %vm572_vm2, %v1783_v7  ;;  %v1786_v12 = vsel %vm572_vm2, %v1783_v7, 0.0  ;;  %v1794_v13 = vmul.f32 %v1783_v7, %v1783_v7  ;;  %v1882_v14 = vpop.f32.mrf.mxu1 }
 0x147   : > { %v2471_v15 = vpop.f32.mrf.mxu0  ;;  %v1787_v21 = vrot.slane %v1786_v12, 4  ;;  %v1187_v14 = vadd.f32 %v1186_v61, %v2842_v59 }
 0x148   : > { %v1795_v19 = vsel %vm572_vm2, %v1794_v13, 0.0  ;;  %v2489_v20 = vpop.f32.mrf.mxu1  ;;  %v1590_v15 = vadd.f32 %v1589_v0, %v1588_v51 }
 0x149   : > { %v1839_v22 = vpop.f32.mrf.mxu0  ;;  %v1796_v27 = vrot.slane %v1795_v19, 4  ;;  %v1788_v33 = vadd.f32 %v1787_v21, %v1786_v12  ;;  %v1196_v20 = vadd.f32 %v1195_v8, %v2844_v4  ;;  %v1389_v1 = vadd.f32 %v1388_v3, %v1187_v14 }
 0x14a   : > { %v1978_v25 = vpop.f32.mrf.mxu1  ;;  %v1880_v43 = vadd.f32 %v1879_v63, %v1839_v22  ;;  %v1599_v21 = vadd.f32 %v1598_v10, %v1597_v57 }
 0x14b   : > { %v2482_v28 = vpop.f32.mrf.mxu0  ;;  %v1797_v39 = vadd.f32 %v1796_v27, %v1795_v19  ;;  %v1789_v46 = vrot.slane %v1788_v33, 2  ;;  %v1591_v26 = vadd.f32 %v1590_v15, %v1389_v1 }
 0x14c   : > { %v2500_v31 = vpop.f32.mrf.mxu1 }
 0x14d   : > { %v1842_v34 = vpop.f32.mrf.mxu0  ;;  %v1798_v52 = vrot.slane %v1797_v39, 2  ;;  %v1790_v58 = vadd.f32 %v1789_v46, %v1788_v33 }
 0x14e   : > { %v1981_v37 = vpop.f32.mrf.mxu1 }
 0x14f   : > { %v2483_v40 = vpop.f32.mrf.mxu0  ;;  %v1799_v62 = vadd.f32 %v1798_v52, %v1797_v39  ;;  %v1791_v11 = vrot.slane %v1790_v58, 1 }
 0x150   : > { %v2501_v44 = vpop.f32.mrf.mxu1 }
 0x151   : > { %v1922_v47 = vpop.f32.mrf.mxu0  ;;  %v1800_v17 = vrot.slane %v1799_v62, 1  ;;  %v1792_v22 = vadd.f32 %v1791_v11, %v1790_v58 }
 0x152   : > { %v1928_v50 = vadd.f32 %v1922_v47, %v1880_v43 }
 0x153   : > { %v2494_v53 = vpop.f32.mrf.mxu0  ;;  %v1801_v27 = vadd.f32 %v1800_v17, %v1799_v62  ;;  %v1793_v59 = vadd.f32 %v1792_v22, %v1591_v26 }
 0x154   : > { %v1984_v56 = vadd.f32 %v1978_v25, %v1928_v50  ;;  %v1398_v25 = vadd.f32 %v1397_v16, %v1196_v20 }
 0x155   : > { %v1925_v60 = vpop.f32.mrf.mxu0 }
 0x156   : > { %2240 = vst.msk [vmem:[%s2828_s12 + $0x38] sm:$0xff] %vm572_vm2, %v1984_v56  ;;  %v1987_v63 = vsel %vm572_vm2, %v1984_v56, 0.0  ;;  %v1995_v6 = vmul.f32 %v1984_v56, %v1984_v56  ;;  %v1600_v30 = vadd.f32 %v1599_v21, %v1398_v25 }
 0x157   : > { %v1988_v2 = vrot.slane %v1987_v63, 4  ;;  %v2495_v7 = vpop.f32.mrf.mxu0 }
 0x158   : > { %v1996_v9 = vsel %vm572_vm2, %v1995_v6, 0.0  ;;  %v1802_v4 = vadd.f32 %v1801_v27, %v1600_v30 }
 0x159   : > { %v1989_v12 = vadd.f32 %v1988_v2, %v1987_v63  ;;  %v1997_v13 = vrot.slane %v1996_v9, 4 }
 0x15b   : > { %v1990_v18 = vrot.slane %v1989_v12, 2  ;;  %v1998_v19 = vadd.f32 %v1997_v13, %v1996_v9 }
 0x15d   : > { %v1991_v23 = vadd.f32 %v1990_v18, %v1989_v12  ;;  %v1999_v24 = vrot.slane %v1998_v19, 2 }
 0x15f   : > { %v1992_v28 = vrot.slane %v1991_v23, 1  ;;  %v2000_v29 = vadd.f32 %v1999_v24, %v1998_v19 }
 0x161   : > { %v1993_v31 = vadd.f32 %v1992_v28, %v1991_v23  ;;  %v2001_v32 = vrot.slane %v2000_v29, 1 }
 0x163   : > { %v1994_v33 = vadd.f32 %v1993_v31, %v1793_v59  ;;  %v2002_v34 = vadd.f32 %v2001_v32, %v2000_v29 }
 0x165   : > { %v2003_v35 = vadd.f32 %v2002_v34, %v1802_v4  ;;  %2005 = vst.msk [vmem:[%s331_s20] sm:$0x1] %vm2004_vm3, %v1994_v33 }
 0x167   : > { %2006 = vst.msk [vmem:[%s331_s20 + $0x1] sm:$0x1] %vm2004_vm3, %v2003_v35 }
 0x168 PF: > { %s15_s17 = sadd.s32 1, %s2566_s17   ;;  %s2886_s15 = smov %s2562_s16 }
 0x169   : > { %p12_p5 = scmp.ge.s32.totalorder %s15_s17, 4   ;;  %s2887_s16 = smov %s2889_s18 }
 0x16b   :  { %14 = sbr.rel (!%p12_p5) target bundleno = 2 (0x2), region = 94 }

</bundles_post_ra>
